<compile_context>
chip_gen: v7x
topology: tpu7x:2x2x1
jax: 0.10.0
libtpu: 0.0.40
codegen_flags: <defaults>
</compile_context>

<pallas_src>
import functools

import numpy as np
import jax
import jax.numpy as jnp
from jax import lax
from jax.experimental import pallas as pl
from jax.experimental.pallas import tpu as pltpu


def _round_up(x, m):
    return ((x + m - 1) // m) * m


# ---------------------------------------------------------------------------
# Fused kernel: ODEBlock(DynamicWeights) single RK4 (3/8-rule) step + grouped
# 1x1 scoring conv.  One grid step = BQ queries; classes are a static unrolled
# loop so only the dense per-class (P, P) transfer matrices are touched.
# ---------------------------------------------------------------------------
def _dw_rk4_score_kernel(q_ref, t_ref, cw_ref, o_ref, *, way, P, L, LP, BQ):
    # q_ref : (1, BQ, C, P)      bf16  query features for this block
    # t_ref : (1, BQ*way, P, P)  bf16  per-(query, class) transfer matrices
    # cw_ref: (1, BQ, C, way)    f32   per-(query, class) channel weights
    # o_ref : (1, BQ, LP)        f32   scores, lane-padded to LP (>= way*P)
    third = 1.0 / 3.0
    rows = []
    for qi in range(BQ):                       # static unroll over queries
        u0 = q_ref[0, qi].astype(jnp.float32)  # (C, P)
        cw = cw_ref[0, qi]                     # (C, way)
        per_class = []
        for wi in range(way):                  # static unroll over classes
            Tm = t_ref[0, qi * way + wi]       # (P, P) bf16

            def F(x, Tm=Tm):
                # DynamicWeights.forward: unfold x per-pixel filter (as matmul) + ReLU
                y = jnp.dot(x.astype(jnp.bfloat16), Tm,
                            preferred_element_type=jnp.float32)
                return jnp.maximum(y, 0.0)

            # torchdiffeq fixed-grid 'rk4' (3/8 rule), one step over t=[0,1], dt=1
            k1 = F(u0)
            k2 = F(u0 + k1 * third)
            k3 = F(u0 + (k2 - k1 * third))
            k4 = F(u0 + (k1 - k2 + k3))
            u1 = u0 + (k1 + 3.0 * (k2 + k3) + k4) * 0.125       # (C, P) f32

            # grouped 1x1 scoring conv: channel dot with this class's weight,
            # weight broadcast across pixels in-kernel (free VPU/layout work).
            s = jnp.sum(u1 * cw[:, wi:wi + 1], axis=0, keepdims=True)  # (1, P)
            per_class.append(s)

        row = jnp.concatenate(per_class, axis=-1)                # (1, L)
        if LP > L:
            row = jnp.concatenate(
                [row, jnp.zeros((1, LP - L), jnp.float32)], axis=-1)
        rows.append(row)

    o_ref[0] = jnp.concatenate(rows, axis=0)                     # (BQ, LP), dense store


def dw_rk4_score(qfeat, T, cw, *, way):
    """qfeat: (G, C, P) f32; T: (G, way, P, P) bf16; cw: (G, C, way) f32.

    Returns (G, way*P) f32 scores (class-major then pixel row-major)."""
    G, C, P = qfeat.shape
    L = way * P
    LP = _round_up(L, 128)                      # lane-dense output tile

    # Queries per grid step: keep >= 2 grid steps when possible (v7x has 2 TCs),
    # amortize the ~0.35us per-step overhead for larger G.
    BQ = max(1, min(8, (G + 1) // 2))
    NB = (G + BQ - 1) // BQ
    Gp = NB * BQ

    def pad_g(x):
        return jnp.pad(x, ((0, Gp - G),) + ((0, 0),) * (x.ndim - 1))

    q_p = pad_g(qfeat.astype(jnp.bfloat16)).reshape(NB, BQ, C, P)
    t_p = pad_g(T.astype(jnp.bfloat16)).reshape(NB, BQ * way, P, P)
    cw_p = pad_g(cw.astype(jnp.float32)).reshape(NB, BQ, C, way)

    kernel = functools.partial(_dw_rk4_score_kernel,
                               way=way, P=P, L=L, LP=LP, BQ=BQ)
    out = pl.pallas_call(
        kernel,
        out_shape=jax.ShapeDtypeStruct((NB, BQ, LP), jnp.float32),
        grid=(NB,),
        in_specs=[
            pl.BlockSpec((1, BQ, C, P), lambda i: (i, 0, 0, 0)),
            pl.BlockSpec((1, BQ * way, P, P), lambda i: (i, 0, 0, 0)),
            pl.BlockSpec((1, BQ, C, way), lambda i: (i, 0, 0, 0)),
        ],
        out_specs=pl.BlockSpec((1, BQ, LP), lambda i: (i, 0, 0)),
        compiler_params=pltpu.CompilerParams(
            dimension_semantics=("parallel",)),
    )(q_p, t_p, cw_p)
    return out.reshape(Gp, LP)[:G, :L]


def _neighbor_matrix(H, W):
    """M[k, p_src, p_dst] = 1 if p_src is the tap-k (3x3, pad=1) neighbour of p_dst."""
    P = H * W
    M = np.zeros((9, P, P), np.float32)
    for dh in range(3):
        for dw in range(3):
            k = dh * 3 + dw
            for h in range(H):
                for w in range(W):
                    hs, ws = h + dh - 1, w + dw - 1
                    if 0 <= hs < H and 0 <= ws < W:
                        M[k, hs * W + ws, h * W + w] = 1.0
    return jnp.asarray(M)


# ---------------------------------------------------------------------------
# DynamicWeights_ pieces (small convolutions routed to XLA per perf review)
# ---------------------------------------------------------------------------
def conv2d_nchw(x, w, padding):
    """Conv2d (bias=False), same padding, NCHW/OIHW via XLA's native TPU conv."""
    return lax.conv_general_dilated(
        x, w, window_strides=(1, 1),
        padding=((padding, padding), (padding, padding)),
        dimension_numbers=('NCHW', 'OIHW', 'NCHW'))


def deform_conv2d(x, offset, weight, padding=1, dilation=1):
    """torchvision-style DCNv1 deformable conv (bias=False)."""
    # TODO(synk): the bilinear sampling at data-dependent offsets is an
    # irregular gather kept in plain XLA; the (C*K)->Co tap contraction is an
    # einsum (N=9 is too narrow to be worth an MXU pallas_call).
    N, C, H, W = x.shape
    Co, _, kh, kw = weight.shape
    K = kh * kw
    off = offset.reshape(N, K, 2, H, W)            # channel 2k = dy, 2k+1 = dx
    ki = (jnp.arange(K) // kw).astype(jnp.float32)
    kj = (jnp.arange(K) % kw).astype(jnp.float32)
    base_y = (-padding + ki * dilation)[None, :, None, None] + \
        jnp.arange(H, dtype=jnp.float32)[None, None, :, None]
    base_x = (-padding + kj * dilation)[None, :, None, None] + \
        jnp.arange(W, dtype=jnp.float32)[None, None, None, :]
    py = base_y + off[:, :, 0]                     # (N, K, H, W)
    px = base_x + off[:, :, 1]

    y0 = jnp.floor(py)
    x0 = jnp.floor(px)
    wy1 = py - y0
    wy0 = 1.0 - wy1
    wx1 = px - x0
    wx0 = 1.0 - wx1

    x_flat = x.reshape(N, C, H * W)

    def sample(yi, xi):
        valid = (yi >= 0) & (yi <= H - 1) & (xi >= 0) & (xi <= W - 1)
        yc = jnp.clip(yi, 0, H - 1).astype(jnp.int32)
        xc = jnp.clip(xi, 0, W - 1).astype(jnp.int32)
        idx = (yc * W + xc).reshape(N, 1, K * H * W)
        g = jnp.take_along_axis(
            x_flat, jnp.broadcast_to(idx, (N, C, K * H * W)), axis=2)
        g = g.reshape(N, C, K, H, W)
        return g * valid.astype(x.dtype)[:, None]

    val = ((wy0 * wx0)[:, None] * sample(y0, x0)
           + (wy0 * wx1)[:, None] * sample(y0, x0 + 1.0)
           + (wy1 * wx0)[:, None] * sample(y0 + 1.0, x0)
           + (wy1 * wx1)[:, None] * sample(y0 + 1.0, x0 + 1.0))  # (N,C,K,H,W)

    return jnp.einsum('nckhw,ock->nohw', val, weight.reshape(Co, C, K))


# ---------------------------------------------------------------------------
# Model parameters & forward
# ---------------------------------------------------------------------------
def init_params(key, nFeat, num_classes, kernel=3, groups=1):
    k1, k2, k3, k4 = jax.random.split(key, 4)
    return dict(
        off_w=jax.random.normal(k1, (3 * 3 * 2, 2 * nFeat, 5, 5), jnp.float32) * 0.05,
        dcn_w=jax.random.normal(k2, (groups * kernel * kernel, nFeat, 3, 3),
                                jnp.float32) * 0.05,
        gcls_w=jax.random.normal(k3, (num_classes, nFeat, 1, 1), jnp.float32) * 0.05,
        gcls_b=jax.random.normal(k4, (num_classes,), jnp.float32) * 0.01,
    )


def model_forward(params, support_feat, query_feat, support_targets,
                  query_targets, training=True):
    b, n_s, c, h, w = support_feat.shape
    n_q = query_feat.shape[1]
    way = support_targets.shape[-1]
    num_classes = params['gcls_w'].shape[0]
    P = h * w

    f32 = jnp.float32
    sup = support_feat.astype(f32)
    qry = query_feat.astype(f32)
    y_s = support_targets.astype(f32)
    y_q = query_targets.astype(f32)

    # ---- prototypes (tiny contraction -> einsum, XLA fuses it) ----
    labels_T = jnp.swapaxes(y_s, 1, 2)                               # (b, way, n_s)
    proto = jnp.einsum('bws,bsf->bwf', labels_T, sup.reshape(b, n_s, -1))
    denom = jnp.maximum(labels_T.sum(axis=2, keepdims=True), 1e-12)  # guard empty class
    proto = (proto / denom).reshape(b, way, c, h, w)

    G = b * n_q
    NN = G * way

    # ---- conv_weight: spatial mean of channel-L2-normalized prototypes ----
    # Depends only on the prototype; kept as (C, way) per query (P-fold broadcast
    # happens inside the Pallas kernel, not in HBM).
    norm = jnp.sqrt(jnp.sum(proto * proto, axis=2, keepdims=True))
    proto_n = proto / jnp.maximum(norm, 1e-12)
    cw_small = proto_n.mean(axis=(3, 4))                             # (b, way, c)
    cw_q = jnp.broadcast_to(jnp.swapaxes(cw_small, 1, 2)[:, None],
                            (b, n_q, c, way)).reshape(G, c, way)     # (G, c, way)

    # ---- offsets: Conv2d(2C->18, 5x5, pad=2, no bias) split by linearity ----
    # TODO(synk): native XLA conv per perf review (im2col+Pallas matmul removed).
    off_w = params['off_w']                                          # (18, 2c, 5, 5)
    q_off = conv2d_nchw(qry.reshape(G, c, h, w), off_w[:, :c], padding=2)
    s_off = conv2d_nchw(proto.reshape(b * way, c, h, w), off_w[:, c:], padding=2)
    offset = (q_off.reshape(b, n_q, 1, 18, h, w)
              + s_off.reshape(b, 1, way, 18, h, w)).reshape(NN, 18, h, w)

    # ---- deformable 3x3 conv on the (broadcast) prototypes ----
    ftrain_ = jnp.broadcast_to(proto[:, None],
                               (b, n_q, way, c, h, w)).reshape(NN, c, h, w)
    dyn_filter = deform_conv2d(ftrain_, offset, params['dcn_w'],
                               padding=1, dilation=1)                # (NN, 9, h, w)

    # ---- per-pixel transfer matrices, built directly in bf16 ----
    # wk reproduces the reference `dynamic_filter.reshape(-1, K)` flat
    # reinterpretation: wk[n, p, k] = dyn_filter.flat[n*9HW + p*9 + k].
    wk = jax.nn.sigmoid(dyn_filter.reshape(NN, P, 9))                # (NN, P, 9)
    M = _neighbor_matrix(h, w).astype(jnp.bfloat16)                  # (9, P, P) 0/1
    T = jnp.einsum('kqp,npk->nqp', M, wk.astype(jnp.bfloat16))       # (NN, Psrc, Pdst)
    T = T.reshape(G, way, P, P)                                      # dense per class

    # ---- fused ODE-RK4 + grouped 1x1 scoring conv (Pallas) ----
    scores = dw_rk4_score(qry.reshape(G, c, P), T, cw_q, way=way)    # (G, way*P)
    cls_scores = scores.reshape(G, way, h, w)
    # F.conv2d(..., padding=1) with bias-free 1x1 kernels -> zero border width 1
    cls_scores = jnp.pad(cls_scores, ((0, 0), (0, 0), (1, 1), (1, 1)))

    if not training:
        return cls_scores.mean(axis=(-1, -2))

    # ---- get_global_pred (label selection + 1x1 classifier as einsum) ----
    # ftest broadcast is identical across the class axis, so the matmul with
    # y reduces to scaling the query by sum_s y[:, :, s].
    ysum = y_q.sum(-1)                                               # (b, n_q)
    feat = qry.reshape(b, n_q, c, P) * ysum[:, :, None, None]
    pred = jnp.einsum('oc,bqcp->bqop', params['gcls_w'].reshape(num_classes, c), feat)
    pred = pred + params['gcls_b'][None, None, :, None]
    global_pred = pred.reshape(G, num_classes, h, w)
    return global_pred, cls_scores


if __name__ == "__main__":
    key = jax.random.PRNGKey(0)
    kp, ks, kq = jax.random.split(key, 3)

    batch_size, n_support, n_query, way = 2, 4, 2, 2
    nFeat, num_classes, H, W = 32, 8, 6, 6

    params = init_params(kp, nFeat, num_classes)

    support_feat = jax.random.normal(
        ks, (batch_size, n_support, nFeat, H, W), jnp.float32)
    query_feat = jax.random.normal(
        kq, (batch_size, n_query, nFeat, H, W), jnp.float32)

    support_labels = jnp.tile(jnp.arange(n_support) % way, (batch_size, 1))
    query_labels = jnp.tile(jnp.arange(n_query) % way, (batch_size, 1))
    support_targets = jax.nn.one_hot(support_labels, way, dtype=jnp.float32)
    query_targets = jax.nn.one_hot(query_labels, way, dtype=jnp.float32)

    fwd = jax.jit(functools.partial(model_forward, training=True))
    global_pred, cls_scores = fwd(params, support_feat, query_feat,
                                  support_targets, query_targets)
    jax.block_until_ready((global_pred, cls_scores))

    assert global_pred.shape == (batch_size * n_query, num_classes, H, W)
    assert cls_scores.shape == (batch_size * n_query, way, H + 2, W + 2)
    print("KERNEL_OK")
</pallas_src>

<mosaic_0001>
module attributes {stable_mosaic.version = 11 : i64} {
  func.func @_dw_rk4_score_kernel(%arg0: i32, %arg1: memref<1x2x32x36xbf16, #tpu.memory_space<vmem>>, %arg2: memref<1x4x36x36xbf16, #tpu.memory_space<vmem>>, %arg3: memref<1x2x32x2xf32, #tpu.memory_space<vmem>>, %arg4: memref<1x2x128xf32, #tpu.memory_space<vmem>>) attributes {dimension_semantics = [#tpu.dimension_semantics<parallel>], iteration_bounds = array<i64: 2>, scalar_prefetch = 0 : i64, scratch_operands = 0 : i64, tpu.core_type = #tpu.core_type<tc>, window_params = [{transform_indices = @transform_0, window_bounds = array<i64: 1, 2, 32, 36>}, {transform_indices = @transform_1, window_bounds = array<i64: 1, 4, 36, 36>}, {transform_indices = @transform_2, window_bounds = array<i64: 1, 2, 32, 2>}, {transform_indices = @transform_3, window_bounds = array<i64: 1, 2, 128>}]} {
    %c0 = arith.constant 0 : index
    %c0_0 = arith.constant 0 : index
    %c0_1 = arith.constant 0 : index
    %c0_2 = arith.constant 0 : index
    %0 = vector.load %arg1[%c0, %c0_0, %c0_1, %c0_2] : memref<1x2x32x36xbf16, #tpu.memory_space<vmem>>, vector<1x1x32x36xbf16>
    %1 = vector.shape_cast %0 : vector<1x1x32x36xbf16> to vector<32x36xbf16>
    %2 = arith.extf %1 : vector<32x36xbf16> to vector<32x36xf32>
    %c0_3 = arith.constant 0 : index
    %c0_4 = arith.constant 0 : index
    %c0_5 = arith.constant 0 : index
    %c0_6 = arith.constant 0 : index
    %3 = vector.load %arg3[%c0_3, %c0_4, %c0_5, %c0_6] : memref<1x2x32x2xf32, #tpu.memory_space<vmem>>, vector<1x1x32x2xf32>
    %4 = vector.shape_cast %3 : vector<1x1x32x2xf32> to vector<32x2xf32>
    %c0_7 = arith.constant 0 : index
    %c0_8 = arith.constant 0 : index
    %c0_9 = arith.constant 0 : index
    %c0_10 = arith.constant 0 : index
    %5 = vector.load %arg2[%c0_7, %c0_8, %c0_9, %c0_10] : memref<1x4x36x36xbf16, #tpu.memory_space<vmem>>, vector<1x1x36x36xbf16>
    %6 = vector.shape_cast %5 : vector<1x1x36x36xbf16> to vector<36x36xbf16>
    %7 = arith.truncf %2 : vector<32x36xf32> to vector<32x36xbf16>
    %cst = arith.constant dense<0.000000e+00> : vector<32x36xf32>
    %8 = tpu.matmul %7, %6, %cst {dimension_numbers = #tpu.dot_dimension_numbers<[1], [0], [0], [1], [0, 0, 1, 1], [], []>} : vector<32x36xbf16>, vector<36x36xbf16>, vector<32x36xf32> -> vector<32x36xf32>
    %cst_11 = arith.constant 0.000000e+00 : f32
    %9 = vector.broadcast %cst_11 : f32 to vector<32x36xf32>
    %10 = arith.maximumf %8, %9 : vector<32x36xf32>
    %cst_12 = arith.constant 0.333333343 : f32
    %11 = vector.broadcast %cst_12 : f32 to vector<32x36xf32>
    %12 = arith.mulf %10, %11 : vector<32x36xf32>
    %13 = arith.addf %2, %12 : vector<32x36xf32>
    %14 = arith.truncf %13 : vector<32x36xf32> to vector<32x36xbf16>
    %cst_13 = arith.constant dense<0.000000e+00> : vector<32x36xf32>
    %15 = tpu.matmul %14, %6, %cst_13 {dimension_numbers = #tpu.dot_dimension_numbers<[1], [0], [0], [1], [0, 0, 1, 1], [], []>} : vector<32x36xbf16>, vector<36x36xbf16>, vector<32x36xf32> -> vector<32x36xf32>
    %cst_14 = arith.constant 0.000000e+00 : f32
    %16 = vector.broadcast %cst_14 : f32 to vector<32x36xf32>
    %17 = arith.maximumf %15, %16 : vector<32x36xf32>
    %cst_15 = arith.constant 0.333333343 : f32
    %18 = vector.broadcast %cst_15 : f32 to vector<32x36xf32>
    %19 = arith.mulf %10, %18 : vector<32x36xf32>
    %20 = arith.subf %17, %19 : vector<32x36xf32>
    %21 = arith.addf %2, %20 : vector<32x36xf32>
    %22 = arith.truncf %21 : vector<32x36xf32> to vector<32x36xbf16>
    %cst_16 = arith.constant dense<0.000000e+00> : vector<32x36xf32>
    %23 = tpu.matmul %22, %6, %cst_16 {dimension_numbers = #tpu.dot_dimension_numbers<[1], [0], [0], [1], [0, 0, 1, 1], [], []>} : vector<32x36xbf16>, vector<36x36xbf16>, vector<32x36xf32> -> vector<32x36xf32>
    %cst_17 = arith.constant 0.000000e+00 : f32
    %24 = vector.broadcast %cst_17 : f32 to vector<32x36xf32>
    %25 = arith.maximumf %23, %24 : vector<32x36xf32>
    %26 = arith.subf %10, %17 : vector<32x36xf32>
    %27 = arith.addf %26, %25 : vector<32x36xf32>
    %28 = arith.addf %2, %27 : vector<32x36xf32>
    %29 = arith.truncf %28 : vector<32x36xf32> to vector<32x36xbf16>
    %cst_18 = arith.constant dense<0.000000e+00> : vector<32x36xf32>
    %30 = tpu.matmul %29, %6, %cst_18 {dimension_numbers = #tpu.dot_dimension_numbers<[1], [0], [0], [1], [0, 0, 1, 1], [], []>} : vector<32x36xbf16>, vector<36x36xbf16>, vector<32x36xf32> -> vector<32x36xf32>
    %cst_19 = arith.constant 0.000000e+00 : f32
    %31 = vector.broadcast %cst_19 : f32 to vector<32x36xf32>
    %32 = arith.maximumf %30, %31 : vector<32x36xf32>
    %33 = arith.addf %17, %25 : vector<32x36xf32>
    %cst_20 = arith.constant 3.000000e+00 : f32
    %34 = vector.broadcast %cst_20 : f32 to vector<32x36xf32>
    %35 = arith.mulf %34, %33 : vector<32x36xf32>
    %36 = arith.addf %10, %35 : vector<32x36xf32>
    %37 = arith.addf %36, %32 : vector<32x36xf32>
    %cst_21 = arith.constant 1.250000e-01 : f32
    %38 = vector.broadcast %cst_21 : f32 to vector<32x36xf32>
    %39 = arith.mulf %37, %38 : vector<32x36xf32>
    %40 = arith.addf %2, %39 : vector<32x36xf32>
    %41 = vector.extract_strided_slice %4 {offsets = [0, 0], sizes = [32, 1], strides = [1, 1]} : vector<32x2xf32> to vector<32x1xf32>
    %42 = vector.broadcast %41 : vector<32x1xf32> to vector<32x36xf32>
    %43 = arith.mulf %40, %42 : vector<32x36xf32>
    %cst_22 = arith.constant dense<0.000000e+00> : vector<36xf32>
    %44 = vector.multi_reduction <add>, %43, %cst_22 [0] : vector<32x36xf32> to vector<36xf32>
    %45 = vector.shape_cast %44 : vector<36xf32> to vector<1x36xf32>
    %c0_23 = arith.constant 0 : index
    %c1 = arith.constant 1 : index
    %c0_24 = arith.constant 0 : index
    %c0_25 = arith.constant 0 : index
    %46 = vector.load %arg2[%c0_23, %c1, %c0_24, %c0_25] : memref<1x4x36x36xbf16, #tpu.memory_space<vmem>>, vector<1x1x36x36xbf16>
    %47 = vector.shape_cast %46 : vector<1x1x36x36xbf16> to vector<36x36xbf16>
    %48 = arith.truncf %2 : vector<32x36xf32> to vector<32x36xbf16>
    %cst_26 = arith.constant dense<0.000000e+00> : vector<32x36xf32>
    %49 = tpu.matmul %48, %47, %cst_26 {dimension_numbers = #tpu.dot_dimension_numbers<[1], [0], [0], [1], [0, 0, 1, 1], [], []>} : vector<32x36xbf16>, vector<36x36xbf16>, vector<32x36xf32> -> vector<32x36xf32>
    %cst_27 = arith.constant 0.000000e+00 : f32
    %50 = vector.broadcast %cst_27 : f32 to vector<32x36xf32>
    %51 = arith.maximumf %49, %50 : vector<32x36xf32>
    %cst_28 = arith.constant 0.333333343 : f32
    %52 = vector.broadcast %cst_28 : f32 to vector<32x36xf32>
    %53 = arith.mulf %51, %52 : vector<32x36xf32>
    %54 = arith.addf %2, %53 : vector<32x36xf32>
    %55 = arith.truncf %54 : vector<32x36xf32> to vector<32x36xbf16>
    %cst_29 = arith.constant dense<0.000000e+00> : vector<32x36xf32>
    %56 = tpu.matmul %55, %47, %cst_29 {dimension_numbers = #tpu.dot_dimension_numbers<[1], [0], [0], [1], [0, 0, 1, 1], [], []>} : vector<32x36xbf16>, vector<36x36xbf16>, vector<32x36xf32> -> vector<32x36xf32>
    %cst_30 = arith.constant 0.000000e+00 : f32
    %57 = vector.broadcast %cst_30 : f32 to vector<32x36xf32>
    %58 = arith.maximumf %56, %57 : vector<32x36xf32>
    %cst_31 = arith.constant 0.333333343 : f32
    %59 = vector.broadcast %cst_31 : f32 to vector<32x36xf32>
    %60 = arith.mulf %51, %59 : vector<32x36xf32>
    %61 = arith.subf %58, %60 : vector<32x36xf32>
    %62 = arith.addf %2, %61 : vector<32x36xf32>
    %63 = arith.truncf %62 : vector<32x36xf32> to vector<32x36xbf16>
    %cst_32 = arith.constant dense<0.000000e+00> : vector<32x36xf32>
    %64 = tpu.matmul %63, %47, %cst_32 {dimension_numbers = #tpu.dot_dimension_numbers<[1], [0], [0], [1], [0, 0, 1, 1], [], []>} : vector<32x36xbf16>, vector<36x36xbf16>, vector<32x36xf32> -> vector<32x36xf32>
    %cst_33 = arith.constant 0.000000e+00 : f32
    %65 = vector.broadcast %cst_33 : f32 to vector<32x36xf32>
    %66 = arith.maximumf %64, %65 : vector<32x36xf32>
    %67 = arith.subf %51, %58 : vector<32x36xf32>
    %68 = arith.addf %67, %66 : vector<32x36xf32>
    %69 = arith.addf %2, %68 : vector<32x36xf32>
    %70 = arith.truncf %69 : vector<32x36xf32> to vector<32x36xbf16>
    %cst_34 = arith.constant dense<0.000000e+00> : vector<32x36xf32>
    %71 = tpu.matmul %70, %47, %cst_34 {dimension_numbers = #tpu.dot_dimension_numbers<[1], [0], [0], [1], [0, 0, 1, 1], [], []>} : vector<32x36xbf16>, vector<36x36xbf16>, vector<32x36xf32> -> vector<32x36xf32>
    %cst_35 = arith.constant 0.000000e+00 : f32
    %72 = vector.broadcast %cst_35 : f32 to vector<32x36xf32>
    %73 = arith.maximumf %71, %72 : vector<32x36xf32>
    %74 = arith.addf %58, %66 : vector<32x36xf32>
    %cst_36 = arith.constant 3.000000e+00 : f32
    %75 = vector.broadcast %cst_36 : f32 to vector<32x36xf32>
    %76 = arith.mulf %75, %74 : vector<32x36xf32>
    %77 = arith.addf %51, %76 : vector<32x36xf32>
    %78 = arith.addf %77, %73 : vector<32x36xf32>
    %cst_37 = arith.constant 1.250000e-01 : f32
    %79 = vector.broadcast %cst_37 : f32 to vector<32x36xf32>
    %80 = arith.mulf %78, %79 : vector<32x36xf32>
    %81 = arith.addf %2, %80 : vector<32x36xf32>
    %82 = vector.extract_strided_slice %4 {offsets = [0, 1], sizes = [32, 1], strides = [1, 1]} : vector<32x2xf32> to vector<32x1xf32>
    %83 = vector.broadcast %82 : vector<32x1xf32> to vector<32x36xf32>
    %84 = arith.mulf %81, %83 : vector<32x36xf32>
    %cst_38 = arith.constant dense<0.000000e+00> : vector<36xf32>
    %85 = vector.multi_reduction <add>, %84, %cst_38 [0] : vector<32x36xf32> to vector<36xf32>
    %86 = vector.shape_cast %85 : vector<36xf32> to vector<1x36xf32>
    %87 = tpu.concatenate %45, %86 in 1 : vector<1x36xf32>, vector<1x36xf32> -> vector<1x72xf32>
    %cst_39 = arith.constant 0.000000e+00 : f32
    %88 = vector.broadcast %cst_39 : f32 to vector<1x56xf32>
    %89 = tpu.concatenate %87, %88 in 1 : vector<1x72xf32>, vector<1x56xf32> -> vector<1x128xf32>
    %c0_40 = arith.constant 0 : index
    %c1_41 = arith.constant 1 : index
    %c0_42 = arith.constant 0 : index
    %c0_43 = arith.constant 0 : index
    %90 = vector.load %arg1[%c0_40, %c1_41, %c0_42, %c0_43] : memref<1x2x32x36xbf16, #tpu.memory_space<vmem>>, vector<1x1x32x36xbf16>
    %91 = vector.shape_cast %90 : vector<1x1x32x36xbf16> to vector<32x36xbf16>
    %92 = arith.extf %91 : vector<32x36xbf16> to vector<32x36xf32>
    %c0_44 = arith.constant 0 : index
    %c1_45 = arith.constant 1 : index
    %c0_46 = arith.constant 0 : index
    %c0_47 = arith.constant 0 : index
    %93 = vector.load %arg3[%c0_44, %c1_45, %c0_46, %c0_47] : memref<1x2x32x2xf32, #tpu.memory_space<vmem>>, vector<1x1x32x2xf32>
    %94 = vector.shape_cast %93 : vector<1x1x32x2xf32> to vector<32x2xf32>
    %c0_48 = arith.constant 0 : index
    %c2 = arith.constant 2 : index
    %c0_49 = arith.constant 0 : index
    %c0_50 = arith.constant 0 : index
    %95 = vector.load %arg2[%c0_48, %c2, %c0_49, %c0_50] : memref<1x4x36x36xbf16, #tpu.memory_space<vmem>>, vector<1x1x36x36xbf16>
    %96 = vector.shape_cast %95 : vector<1x1x36x36xbf16> to vector<36x36xbf16>
    %97 = arith.truncf %92 : vector<32x36xf32> to vector<32x36xbf16>
    %cst_51 = arith.constant dense<0.000000e+00> : vector<32x36xf32>
    %98 = tpu.matmul %97, %96, %cst_51 {dimension_numbers = #tpu.dot_dimension_numbers<[1], [0], [0], [1], [0, 0, 1, 1], [], []>} : vector<32x36xbf16>, vector<36x36xbf16>, vector<32x36xf32> -> vector<32x36xf32>
    %cst_52 = arith.constant 0.000000e+00 : f32
    %99 = vector.broadcast %cst_52 : f32 to vector<32x36xf32>
    %100 = arith.maximumf %98, %99 : vector<32x36xf32>
    %cst_53 = arith.constant 0.333333343 : f32
    %101 = vector.broadcast %cst_53 : f32 to vector<32x36xf32>
    %102 = arith.mulf %100, %101 : vector<32x36xf32>
    %103 = arith.addf %92, %102 : vector<32x36xf32>
    %104 = arith.truncf %103 : vector<32x36xf32> to vector<32x36xbf16>
    %cst_54 = arith.constant dense<0.000000e+00> : vector<32x36xf32>
    %105 = tpu.matmul %104, %96, %cst_54 {dimension_numbers = #tpu.dot_dimension_numbers<[1], [0], [0], [1], [0, 0, 1, 1], [], []>} : vector<32x36xbf16>, vector<36x36xbf16>, vector<32x36xf32> -> vector<32x36xf32>
    %cst_55 = arith.constant 0.000000e+00 : f32
    %106 = vector.broadcast %cst_55 : f32 to vector<32x36xf32>
    %107 = arith.maximumf %105, %106 : vector<32x36xf32>
    %cst_56 = arith.constant 0.333333343 : f32
    %108 = vector.broadcast %cst_56 : f32 to vector<32x36xf32>
    %109 = arith.mulf %100, %108 : vector<32x36xf32>
    %110 = arith.subf %107, %109 : vector<32x36xf32>
    %111 = arith.addf %92, %110 : vector<32x36xf32>
    %112 = arith.truncf %111 : vector<32x36xf32> to vector<32x36xbf16>
    %cst_57 = arith.constant dense<0.000000e+00> : vector<32x36xf32>
    %113 = tpu.matmul %112, %96, %cst_57 {dimension_numbers = #tpu.dot_dimension_numbers<[1], [0], [0], [1], [0, 0, 1, 1], [], []>} : vector<32x36xbf16>, vector<36x36xbf16>, vector<32x36xf32> -> vector<32x36xf32>
    %cst_58 = arith.constant 0.000000e+00 : f32
    %114 = vector.broadcast %cst_58 : f32 to vector<32x36xf32>
    %115 = arith.maximumf %113, %114 : vector<32x36xf32>
    %116 = arith.subf %100, %107 : vector<32x36xf32>
    %117 = arith.addf %116, %115 : vector<32x36xf32>
    %118 = arith.addf %92, %117 : vector<32x36xf32>
    %119 = arith.truncf %118 : vector<32x36xf32> to vector<32x36xbf16>
    %cst_59 = arith.constant dense<0.000000e+00> : vector<32x36xf32>
    %120 = tpu.matmul %119, %96, %cst_59 {dimension_numbers = #tpu.dot_dimension_numbers<[1], [0], [0], [1], [0, 0, 1, 1], [], []>} : vector<32x36xbf16>, vector<36x36xbf16>, vector<32x36xf32> -> vector<32x36xf32>
    %cst_60 = arith.constant 0.000000e+00 : f32
    %121 = vector.broadcast %cst_60 : f32 to vector<32x36xf32>
    %122 = arith.maximumf %120, %121 : vector<32x36xf32>
    %123 = arith.addf %107, %115 : vector<32x36xf32>
    %cst_61 = arith.constant 3.000000e+00 : f32
    %124 = vector.broadcast %cst_61 : f32 to vector<32x36xf32>
    %125 = arith.mulf %124, %123 : vector<32x36xf32>
    %126 = arith.addf %100, %125 : vector<32x36xf32>
    %127 = arith.addf %126, %122 : vector<32x36xf32>
    %cst_62 = arith.constant 1.250000e-01 : f32
    %128 = vector.broadcast %cst_62 : f32 to vector<32x36xf32>
    %129 = arith.mulf %127, %128 : vector<32x36xf32>
    %130 = arith.addf %92, %129 : vector<32x36xf32>
    %131 = vector.extract_strided_slice %94 {offsets = [0, 0], sizes = [32, 1], strides = [1, 1]} : vector<32x2xf32> to vector<32x1xf32>
    %132 = vector.broadcast %131 : vector<32x1xf32> to vector<32x36xf32>
    %133 = arith.mulf %130, %132 : vector<32x36xf32>
    %cst_63 = arith.constant dense<0.000000e+00> : vector<36xf32>
    %134 = vector.multi_reduction <add>, %133, %cst_63 [0] : vector<32x36xf32> to vector<36xf32>
    %135 = vector.shape_cast %134 : vector<36xf32> to vector<1x36xf32>
    %c0_64 = arith.constant 0 : index
    %c3 = arith.constant 3 : index
    %c0_65 = arith.constant 0 : index
    %c0_66 = arith.constant 0 : index
    %136 = vector.load %arg2[%c0_64, %c3, %c0_65, %c0_66] : memref<1x4x36x36xbf16, #tpu.memory_space<vmem>>, vector<1x1x36x36xbf16>
    %137 = vector.shape_cast %136 : vector<1x1x36x36xbf16> to vector<36x36xbf16>
    %138 = arith.truncf %92 : vector<32x36xf32> to vector<32x36xbf16>
    %cst_67 = arith.constant dense<0.000000e+00> : vector<32x36xf32>
    %139 = tpu.matmul %138, %137, %cst_67 {dimension_numbers = #tpu.dot_dimension_numbers<[1], [0], [0], [1], [0, 0, 1, 1], [], []>} : vector<32x36xbf16>, vector<36x36xbf16>, vector<32x36xf32> -> vector<32x36xf32>
    %cst_68 = arith.constant 0.000000e+00 : f32
    %140 = vector.broadcast %cst_68 : f32 to vector<32x36xf32>
    %141 = arith.maximumf %139, %140 : vector<32x36xf32>
    %cst_69 = arith.constant 0.333333343 : f32
    %142 = vector.broadcast %cst_69 : f32 to vector<32x36xf32>
    %143 = arith.mulf %141, %142 : vector<32x36xf32>
    %144 = arith.addf %92, %143 : vector<32x36xf32>
    %145 = arith.truncf %144 : vector<32x36xf32> to vector<32x36xbf16>
    %cst_70 = arith.constant dense<0.000000e+00> : vector<32x36xf32>
    %146 = tpu.matmul %145, %137, %cst_70 {dimension_numbers = #tpu.dot_dimension_numbers<[1], [0], [0], [1], [0, 0, 1, 1], [], []>} : vector<32x36xbf16>, vector<36x36xbf16>, vector<32x36xf32> -> vector<32x36xf32>
    %cst_71 = arith.constant 0.000000e+00 : f32
    %147 = vector.broadcast %cst_71 : f32 to vector<32x36xf32>
    %148 = arith.maximumf %146, %147 : vector<32x36xf32>
    %cst_72 = arith.constant 0.333333343 : f32
    %149 = vector.broadcast %cst_72 : f32 to vector<32x36xf32>
    %150 = arith.mulf %141, %149 : vector<32x36xf32>
    %151 = arith.subf %148, %150 : vector<32x36xf32>
    %152 = arith.addf %92, %151 : vector<32x36xf32>
    %153 = arith.truncf %152 : vector<32x36xf32> to vector<32x36xbf16>
    %cst_73 = arith.constant dense<0.000000e+00> : vector<32x36xf32>
    %154 = tpu.matmul %153, %137, %cst_73 {dimension_numbers = #tpu.dot_dimension_numbers<[1], [0], [0], [1], [0, 0, 1, 1], [], []>} : vector<32x36xbf16>, vector<36x36xbf16>, vector<32x36xf32> -> vector<32x36xf32>
    %cst_74 = arith.constant 0.000000e+00 : f32
    %155 = vector.broadcast %cst_74 : f32 to vector<32x36xf32>
    %156 = arith.maximumf %154, %155 : vector<32x36xf32>
    %157 = arith.subf %141, %148 : vector<32x36xf32>
    %158 = arith.addf %157, %156 : vector<32x36xf32>
    %159 = arith.addf %92, %158 : vector<32x36xf32>
    %160 = arith.truncf %159 : vector<32x36xf32> to vector<32x36xbf16>
    %cst_75 = arith.constant dense<0.000000e+00> : vector<32x36xf32>
    %161 = tpu.matmul %160, %137, %cst_75 {dimension_numbers = #tpu.dot_dimension_numbers<[1], [0], [0], [1], [0, 0, 1, 1], [], []>} : vector<32x36xbf16>, vector<36x36xbf16>, vector<32x36xf32> -> vector<32x36xf32>
    %cst_76 = arith.constant 0.000000e+00 : f32
    %162 = vector.broadcast %cst_76 : f32 to vector<32x36xf32>
    %163 = arith.maximumf %161, %162 : vector<32x36xf32>
    %164 = arith.addf %148, %156 : vector<32x36xf32>
    %cst_77 = arith.constant 3.000000e+00 : f32
    %165 = vector.broadcast %cst_77 : f32 to vector<32x36xf32>
    %166 = arith.mulf %165, %164 : vector<32x36xf32>
    %167 = arith.addf %141, %166 : vector<32x36xf32>
    %168 = arith.addf %167, %163 : vector<32x36xf32>
    %cst_78 = arith.constant 1.250000e-01 : f32
    %169 = vector.broadcast %cst_78 : f32 to vector<32x36xf32>
    %170 = arith.mulf %168, %169 : vector<32x36xf32>
    %171 = arith.addf %92, %170 : vector<32x36xf32>
    %172 = vector.extract_strided_slice %94 {offsets = [0, 1], sizes = [32, 1], strides = [1, 1]} : vector<32x2xf32> to vector<32x1xf32>
    %173 = vector.broadcast %172 : vector<32x1xf32> to vector<32x36xf32>
    %174 = arith.mulf %171, %173 : vector<32x36xf32>
    %cst_79 = arith.constant dense<0.000000e+00> : vector<36xf32>
    %175 = vector.multi_reduction <add>, %174, %cst_79 [0] : vector<32x36xf32> to vector<36xf32>
    %176 = vector.shape_cast %175 : vector<36xf32> to vector<1x36xf32>
    %177 = tpu.concatenate %135, %176 in 1 : vector<1x36xf32>, vector<1x36xf32> -> vector<1x72xf32>
    %cst_80 = arith.constant 0.000000e+00 : f32
    %178 = vector.broadcast %cst_80 : f32 to vector<1x56xf32>
    %179 = tpu.concatenate %177, %178 in 1 : vector<1x72xf32>, vector<1x56xf32> -> vector<1x128xf32>
    %180 = tpu.concatenate %89, %179 in 0 : vector<1x128xf32>, vector<1x128xf32> -> vector<2x128xf32>
    %c0_81 = arith.constant 0 : index
    %c0_82 = arith.constant 0 : index
    %c0_83 = arith.constant 0 : index
    %181 = vector.load %arg4[%c0_81, %c0_82, %c0_83] : memref<1x2x128xf32, #tpu.memory_space<vmem>>, vector<1x2x128xf32>
    %182 = vector.shape_cast %181 : vector<1x2x128xf32> to vector<2x128xf32>
    %183 = vector.shape_cast %180 : vector<2x128xf32> to vector<1x2x128xf32>
    tpu.vector_store %arg4[%c0_81, %c0_82, %c0_83], %183 {strides = array<i32>} : memref<1x2x128xf32, #tpu.memory_space<vmem>>, vector<1x2x128xf32>,
    return
  }
  func.func @transform_0(%arg0: i32) -> (i32, i32, i32, i32) {
    %c0_i32 = arith.constant 0 : i32
    %c0_i32_0 = arith.constant 0 : i32
    %c0_i32_1 = arith.constant 0 : i32
    %c0_i32_2 = arith.constant 0 : i32
    return %arg0, %c0_i32, %c0_i32_0, %c0_i32_1 : i32, i32, i32, i32
  }
  func.func @transform_1(%arg0: i32) -> (i32, i32, i32, i32) {
    %c0_i32 = arith.constant 0 : i32
    %c0_i32_0 = arith.constant 0 : i32
    %c0_i32_1 = arith.constant 0 : i32
    %c0_i32_2 = arith.constant 0 : i32
    return %arg0, %c0_i32, %c0_i32_0, %c0_i32_1 : i32, i32, i32, i32
  }
  func.func @transform_2(%arg0: i32) -> (i32, i32, i32, i32) {
    %c0_i32 = arith.constant 0 : i32
    %c0_i32_0 = arith.constant 0 : i32
    %c0_i32_1 = arith.constant 0 : i32
    %c0_i32_2 = arith.constant 0 : i32
    return %arg0, %c0_i32, %c0_i32_0, %c0_i32_1 : i32, i32, i32, i32
  }
  func.func @transform_3(%arg0: i32) -> (i32, i32, i32) {
    %c0_i32 = arith.constant 0 : i32
    %c0_i32_0 = arith.constant 0 : i32
    %c0_i32_1 = arith.constant 0 : i32
    return %arg0, %c0_i32, %c0_i32_0 : i32, i32, i32
  }
}

</mosaic_0001>

<bundles_post_ra>
// kernel: model_forward.1
= control target key start
LH: loop header
LB: loop body
LE: loop exit
PB: predicated region body
PF: predicated region fallthrough
CT: control target
= control target key end

     0   :  { %s2163_s12 = smov 0   ;;  %s2733_s0 = inlined_call_operand.vmem [shape: bf16[2,2,32,36], index: 0, kind: input, shape index: {}]   ;;  %s2734_s1 = inlined_call_operand.vmem [shape: bf16[2,4,36,36], index: 1, kind: input, shape index: {}]   ;;  %s2735_s2 = inlined_call_operand.vmem [shape: f32[2,2,32,2], index: 2, kind: input, shape index: {}]   ;;  %s2736_s3 = inlined_call_operand.vmem [shape: f32[2,2,128], index: 3, kind: output, shape index: {}]  }
   0x1 LB: > { %s1753_s13 = sadd.s32 4294967295, %s2138_s12   ;;  %p1757_p0 = scmp.ge.s32.totalorder %s2138_s12, 1  ;;  %s2138_s12 = sphi %s2163_s12, %s13_s12  }
   0x2   : > { %p157_p1 = scmp.lt.s32.totalorder %s2138_s12, 3 }
   0x4   : > { %p158_p2 = pnand %p1757_p0, %p157_p1 }
   0x5   : > { %p190_p3 = scmp.lt.s32.totalorder (!%p158_p2), %s1753_s13, 1  ;;  %vm252_vm0 = vcmask (!%p158_p2), 293888   ;;  %vm259_vm1 = vcmask (!%p158_p2), 1041408   ;;  %v2140_v50 = vmov (!%p158_p2), 1   ;;  %v2141_v59 = vmov (!%p158_p2), 0   ;;  %s2142_s26 = smov (!%p158_p2), 36  }
   0x6   : > { %161 = sbr.rel (%p158_p2) target bundleno = 2447 (0x98f), region = 32  ;;  %2107 = vset.pattern.permute.xlu0 (!%p158_p2), %v2140_v50  ;;  %2108 = vset.pattern.permute.xlu1 (!%p158_p2), %v2140_v50  ;;  %vm938_vm2 = vcmask (!%p158_p2), 588800   ;;  %vm1673_vm3 = vcmask (!%p158_p2), 1040384  }
   0xd   : > { %s2738_s13 = smov (!%p190_p3, %s1753_s13), 1 }
   0xe   : > { %s2095_s14 = smul.u32 80, %s2738_s13  ;;  %s1837_s15 = sshll.u32 %s2738_s13, 5 }
   0xf   : > { %s2178_s18 = scalar_lea.vmem %s2733_s0, %s1837_s15  ;;  %s1838_s22 = sshll.u32 %s2738_s13, 6 }
  0x10   : > { %s2183_s21 = scalar_lea.vmem %s2734_s1, %s2095_s14  ;;  %v2186_v0 = vld [vmem:[%s2178_s18] sm:$0xff]   ;;  %v2194_v4 = vld [vmem:[%s2178_s18 + $0x8] sm:$0xff]   ;;  %s204_s25 = scalar_lea.vmem %s2735_s2, %s1838_s22 }
  0x11   : > { %v2112_v1 = vld [vmem:[%s2183_s21] sm:$0xff]   ;;  %v2113_v2 = vld [vmem:[%s2183_s21 + $0x8] sm:$0xff]   ;;  %v2114_v3 = vld [vmem:[%s2183_s21 + $0x10] ss:$0 sps:$4 sm:$0x33]   ;;  %1925 = vmatprep.mubr.msk.bf16.mxu0 %vm252_vm0, %v2186_v0  ;;  %v2207_v11 = vunpack.c.h.bf16 %v2194_v4  ;;  %v2212_v14 = vunpack.c.l.bf16 %v2186_v0  ;;  %v2215_v15 = vunpack.c.h.bf16 %v2186_v0  ;;  %v2221_v18 = vunpack.c.l.bf16 %v2194_v4  ;;  %s1763_s27 = sshll.u32 %s2738_s13, 1 }
  0x12   : > { %1919 = vmatprep.subr.bf16.mxu0 %v2112_v1  ;;  %1929 = vmatprep.subr.bf16.mxu1 %v2112_v1  ;;  %v261_v5 = vsel %vm259_vm1, %v2114_v3, 0  ;;  %v2234_v28 = vld [vmem:[%s2183_s21 + $0x14] sm:$0xff]   ;;  %v2255_v47 = vld [vmem:[%s2183_s21 + $0x1c] sm:$0xff]   ;;  %v2264_v48 = vld [vmem:[%s2183_s21 + $0x24] ss:$0 sps:$4 sm:$0x33]   ;;  %s208_s30 = scalar_lea.vmem %s2736_s3, %s1763_s27 }
  0x13   : > { %1920 = vmatpush3.bf16.msra.mxu0 %v2112_v1  ;;  %1930 = vmatpush3.bf16.msra.mxu1 %v2112_v1  ;;  %v2271_v49 = vsel %vm259_vm1, %v2264_v48, 0  ;;  %v1797_v51 = vld [vmem:[%s204_s25 + $0x20] sm:$0xff]  ;;  %v1798_v53 = vld [vmem:[%s204_s25 + $0x28] sm:$0xff]  ;;  %v1799_v55 = vld [vmem:[%s204_s25 + $0x30] sm:$0xff] }
  0x14   : > { %1921 = vmatprep.subr.bf16.mxu0 %v2113_v2  ;;  %1931 = vmatprep.subr.bf16.mxu1 %v2113_v2  ;;  %v218_v52 = vld [vmem:[%s204_s25] sm:$0xff]  ;;  %v219_v54 = vld [vmem:[%s204_s25 + $0x8] sm:$0xff]  ;;  %v220_v56 = vld [vmem:[%s204_s25 + $0x10] sm:$0xff] }
  0x15   : > { %1632 = vperm.xlu0 %2107, %v1797_v51   ;;  %901 = vperm.xlu1 %2108, %v218_v52   ;;  %v1800_v57 = vld [vmem:[%s204_s25 + $0x38] sm:$0xff] }
  0x16   : > { %v221_v58 = vld [vmem:[%s204_s25 + $0x18] sm:$0xff] }
  0x17   : > { %1922 = vmatpush3.bf16.msra.mxu0 %v2113_v2  ;;  %1932 = vmatpush3.bf16.msra.mxu1 %v2113_v2 }
  0x18   : > { %2079 = vmatprep.subr.msk.bf16.mxu0 %vm259_vm1, %v2114_v3  ;;  %2080 = vmatprep.subr.msk.bf16.mxu1 %vm259_vm1, %v2114_v3 }
  0x19   : > { %1636 = vperm.xlu0 %2107, %v1798_v53   ;;  %905 = vperm.xlu1 %2108, %v219_v54  }
  0x1b   : > { %1924 = vmatpush3.bf16.msra.mxu0 %v261_v5  ;;  %1934 = vmatpush3.bf16.msra.mxu1 %v261_v5 }
  0x1c   : > { %1939 = vmatprep.subr.bf16.mxu0 %v2112_v1  ;;  %1949 = vmatprep.subr.bf16.mxu1 %v2112_v1 }
  0x1d   : > { %1640 = vperm.xlu0 %2107, %v1799_v55   ;;  %909 = vperm.xlu1 %2108, %v220_v56  }
  0x1e   : > { %1926 = vmatmul.mubr.msk.bf16.vlgmr.msra.gmra.mrb[0].mxu0 %vm252_vm0, %v2194_v4 }
  0x1f   : > { %1940 = vmatpush3.bf16.msra.mxu0 %v2112_v1 }
  0x20   : > { %1941 = vmatprep.subr.bf16.mxu0 %v2113_v2 }
  0x21   : > { %1644 = vperm.xlu0 %2107, %v1800_v57   ;;  %913 = vperm.xlu1 %2108, %v221_v58  }
  0x23   : > { %1942 = vmatpush3.bf16.msra.mxu0 %v2113_v2 }
  0x24   : > { %2081 = vmatprep.subr.msk.bf16.mxu0 %vm259_vm1, %v2114_v3 }
  0x25   : > { %2109 = vset.pattern.permute.xlu0 %v2141_v59  ;;  %2110 = vset.pattern.permute.xlu1 %v2141_v59 }
  0x26   : > { %1284 = vperm.xlu0 %2109, %v1797_v51   ;;  %1289 = vperm.xlu1 %2110, %v1798_v53  }
  0x27   : > { %1944 = vmatpush3.bf16.msra.mxu0 %v261_v5 }
  0x28   : > { %1959 = vmatprep.subr.bf16.mxu0 %v2234_v28 }
  0x2a   : > { %558 = vperm.xlu0 %2109, %v219_v54   ;;  %553 = vperm.xlu1 %2110, %v218_v52   ;;  %v2358_v52 = vld [vmem:[%s2183_s21 + $0x28] sm:$0xff]  }
  0x2e   : > { %563 = vperm.xlu0 %2109, %v220_v56   ;;  %1294 = vperm.xlu1 %2110, %v1799_v55  }
  0x32   : > { %568 = vperm.xlu0 %2109, %v221_v58   ;;  %1299 = vperm.xlu1 %2110, %v1800_v57  }
  0x36   : > { %2111 = vset.pattern.permute.xlu0 %v2140_v50 }
  0x94   : > { %v2362_v53 = vpop.permute.xlu0 %1632 }
  0x98   : > { %v2364_v54 = vpop.permute.xlu0 %1636 }
  0x9c   : > { %v2368_v55 = vpop.permute.xlu0 %1640 }
  0xa0   : > { %v2372_v56 = vpop.permute.xlu0 %1644 }
  0xa5   : > { %v2379_v57 = vpop.permute.xlu0 %1284 }
  0xf1   : > { %v1927_v6 = vpop.f32.mrb[0].mxu0 }
  0xf2   : > { %v2202_v7 = vmax.f32 %v1927_v6, 0.0  ;;  %v297_v8 = vpop.f32.mrb[1].mxu0 }
  0xf3   : > { %v2204_v9 = vmax.f32 %v297_v8, 0.0  ;;  %v1928_v10 = vpop.f32.mrb[2].mxu0 }
  0xf4   : > { %v2209_v12 = vmax.f32 %v1928_v10, 0.0  ;;  %v300_v13 = vpop.f32.mrb[3].mxu0  ;;  %v318_v19 = vmul.f32 0.33333334, %v2202_v7 }
  0xf5   : > { %v316_v16 = vmul.f32 0.33333334, %v2204_v9  ;;  %v2218_v17 = vmax.f32 %v300_v13, 0.0 }
  0xf6   : > { %v319_v20 = vmul.f32 0.33333334, %v2209_v12  ;;  %v322_v25 = vadd.f32 %v318_v19, %v2221_v18 }
  0xf7   : > { %v317_v21 = vmul.f32 0.33333334, %v2218_v17  ;;  %v320_v23 = vadd.f32 %v316_v16, %v2212_v14 }
  0xf8   : > { %v323_v22 = vadd.f32 %v319_v20, %v2207_v11 }
  0xf9   : > { %v321_v24 = vadd.f32 %v317_v21, %v2215_v15 }
  0xfa   : > { %v325_v27 = vpack.c.bf16 %v323_v22, %v322_v25 }
  0xfb   : > { %v324_v26 = vpack.c.bf16 %v321_v24, %v320_v23 }
  0xfd   : > { %1935 = vmatprep.mubr.msk.bf16.mxu1 %vm252_vm0, %v324_v26 }
  0xfe   : > { %1936 = vmatmul.mubr.msk.bf16.vlgmr.msra.gmra.mrb[0].mxu1 %vm252_vm0, %v325_v27 }
  0xff   : > { %1950 = vmatpush3.bf16.msra.mxu1 %v2112_v1 }
 0x100   : > { %1951 = vmatprep.subr.bf16.mxu1 %v2113_v2 }
 0x103   : > { %1952 = vmatpush3.bf16.msra.mxu1 %v2113_v2 }
 0x104   : > { %2082 = vmatprep.subr.msk.bf16.mxu1 %vm259_vm1, %v2114_v3 }
 0x107   : > { %1954 = vmatpush3.bf16.msra.mxu1 %v261_v5 }
 0x108   : > { %1969 = vmatprep.subr.bf16.mxu1 %v2234_v28 }
 0x1d1   : > { %v1937_v29 = vpop.f32.mrb[0].mxu1 }
 0x1d2   : > { %v2238_v30 = vmax.f32 %v1937_v29, 0.0  ;;  %v366_v31 = vpop.f32.mrb[1].mxu1 }
 0x1d3   : > { %v2240_v32 = vmax.f32 %v366_v31, 0.0  ;;  %v1938_v33 = vpop.f32.mrb[2].mxu1 }
 0x1d4   : > { %v2242_v34 = vmax.f32 %v1938_v33, 0.0  ;;  %v369_v35 = vpop.f32.mrb[3].mxu1  ;;  %v387_v38 = vsub.f32 %v2238_v30, %v318_v19  ;;  %v456_v62 = vsub.f32 %v2202_v7, %v2238_v30 }
 0x1d5   : > { %v385_v36 = vsub.f32 %v2240_v32, %v316_v16  ;;  %v2245_v37 = vmax.f32 %v369_v35, 0.0  ;;  %v454_v1 = vsub.f32 %v2204_v9, %v2240_v32 }
 0x1d6   : > { %v388_v39 = vsub.f32 %v2242_v34, %v319_v20  ;;  %v391_v44 = vadd.f32 %v387_v38, %v2221_v18  ;;  %v457_v5 = vsub.f32 %v2209_v12, %v2242_v34 }
 0x1d7   : > { %v386_v40 = vsub.f32 %v2245_v37, %v317_v21  ;;  %v389_v42 = vadd.f32 %v385_v36, %v2212_v14  ;;  %v455_v13 = vsub.f32 %v2218_v17, %v2245_v37 }
 0x1d8   : > { %v392_v41 = vadd.f32 %v388_v39, %v2207_v11 }
 0x1d9   : > { %v390_v43 = vadd.f32 %v386_v40, %v2215_v15 }
 0x1da   : > { %v394_v46 = vpack.c.bf16 %v392_v41, %v391_v44 }
 0x1db   : > { %v393_v45 = vpack.c.bf16 %v390_v43, %v389_v42 }
 0x1dd   : > { %1945 = vmatprep.mubr.msk.bf16.mxu0 %vm252_vm0, %v393_v45 }
 0x1de   : > { %1946 = vmatmul.mubr.msk.bf16.vlgmr.msra.gmra.mrb[4].mxu0 %vm252_vm0, %v394_v46 }
 0x1df   : > { %1960 = vmatpush3.bf16.msra.mxu0 %v2234_v28  ;;  %1965 = vmatprep.mubr.msk.bf16.mxu0 %vm252_vm0, %v2186_v0 }
 0x1e0   : > { %1961 = vmatprep.subr.bf16.mxu0 %v2255_v47 }
 0x1e3   : > { %1962 = vmatpush3.bf16.msra.mxu0 %v2255_v47 }
 0x1e4   : > { %2083 = vmatprep.subr.msk.bf16.mxu0 %vm259_vm1, %v2264_v48 }
 0x1e7   : > { %1964 = vmatpush3.bf16.msra.mxu0 %v2271_v49 }
 0x1e8   : > { %1979 = vmatprep.subr.bf16.mxu0 %v2234_v28 }
 0x1ea   : > { %1966 = vmatmul.mubr.msk.bf16.vlgmr.msra.gmra.mrb[8].mxu0 %vm252_vm0, %v2194_v4 }
 0x1eb   : > { %1980 = vmatpush3.bf16.msra.mxu0 %v2234_v28 }
 0x1ec   : > { %1981 = vmatprep.subr.bf16.mxu0 %v2255_v47 }
 0x1ef   : > { %1982 = vmatpush3.bf16.msra.mxu0 %v2255_v47 }
 0x1f0   : > { %2085 = vmatprep.subr.msk.bf16.mxu0 %vm259_vm1, %v2264_v48 }
 0x1f3   : > { %1984 = vmatpush3.bf16.msra.mxu0 %v2271_v49 }
 0x1f4   : > { %1999 = vmatprep.subr.bf16.mxu0 %v2358_v52 }
 0x2b1   : > { %v2287_v60 = vpop.f32.mrb[4].mxu0 }
 0x2b2   : > { %v452_v61 = vmax.f32 %v2287_v60, 0.0  ;;  %v2292_v63 = vpop.f32.mrb[5].mxu0 }
 0x2b3   : > { %v450_v0 = vmax.f32 %v2292_v63, 0.0  ;;  %v2297_v2 = vpop.f32.mrb[6].mxu0 }
 0x2b4   : > { %v460_v3 = vadd.f32 %v456_v62, %v452_v61  ;;  %v453_v4 = vmax.f32 %v2297_v2, 0.0  ;;  %v438_v6 = vpop.f32.mrb[7].mxu0 }
 0x2b5   : > { %v458_v8 = vadd.f32 %v454_v1, %v450_v0  ;;  %v451_v10 = vmax.f32 %v438_v6, 0.0  ;;  %v527_v58 = vadd.f32 %v450_v0, %v2240_v32  ;;  %v559_v6 = vpop.permute.xlu0 %558 }
 0x2b6   : > { %v461_v16 = vadd.f32 %v457_v5, %v453_v4  ;;  %v464_v20 = vadd.f32 %v460_v3, %v2221_v18  ;;  %v530_v59 = vadd.f32 %v453_v4, %v2242_v34 }
 0x2b7   : > { %v459_v19 = vadd.f32 %v455_v13, %v451_v10  ;;  %v462_v22 = vadd.f32 %v458_v8, %v2212_v14  ;;  %v528_v1 = vadd.f32 %v451_v10, %v2245_v37  ;;  %v531_v3 = vmul.f32 3.0, %v527_v58 }
 0x2b8   : > { %v465_v21 = vadd.f32 %v461_v16, %v2207_v11  ;;  %v534_v5 = vmul.f32 3.0, %v530_v59 }
 0x2b9   : > { %v463_v23 = vadd.f32 %v459_v19, %v2215_v15  ;;  %v532_v8 = vmul.f32 3.0, %v528_v1  ;;  %v535_v32 = vadd.f32 %v531_v3, %v2204_v9 }
 0x2ba   : > { %v467_v24 = vpack.c.bf16 %v465_v21, %v464_v20  ;;  %v538_v37 = vadd.f32 %v534_v5, %v2209_v12 }
 0x2bb   : > { %v466_v25 = vpack.c.bf16 %v463_v23, %v462_v22  ;;  %v536_v21 = vadd.f32 %v532_v8, %v2218_v17 }
 0x2bd   : > { %v1967_v26 = vpop.f32.mrb[8].mxu0  ;;  %1955 = vmatprep.mubr.msk.bf16.mxu1 %vm252_vm0, %v466_v25 }
 0x2be   : > { %v2313_v27 = vmax.f32 %v1967_v26, 0.0  ;;  %v646_v29 = vpop.f32.mrb[9].mxu0  ;;  %1956 = vmatmul.mubr.msk.bf16.vlgmr.msra.gmra.mrb[4].mxu1 %vm252_vm0, %v467_v24  ;;  %v564_v24 = vpop.permute.xlu0 %563 }
 0x2bf   : > { %v2316_v31 = vmax.f32 %v646_v29, 0.0  ;;  %v1968_v33 = vpop.f32.mrb[10].mxu0  ;;  %1970 = vmatpush3.bf16.msra.mxu1 %v2234_v28 }
 0x2c0   : > { %v2319_v35 = vmax.f32 %v1968_v33, 0.0  ;;  %v649_v36 = vpop.f32.mrb[11].mxu0  ;;  %1971 = vmatprep.subr.bf16.mxu1 %v2255_v47  ;;  %v2328_v40 = vmul.f32 0.33333334, %v2313_v27 }
 0x2c1   : > { %v2323_v38 = vmul.f32 0.33333334, %v2316_v31  ;;  %v2325_v39 = vmax.f32 %v649_v36, 0.0 }
 0x2c2   : > { %v2331_v41 = vmul.f32 0.33333334, %v2319_v35  ;;  %v671_v46 = vadd.f32 %v2328_v40, %v2221_v18 }
 0x2c3   : > { %v2334_v42 = vmul.f32 0.33333334, %v2325_v39  ;;  %1972 = vmatpush3.bf16.msra.mxu1 %v2255_v47  ;;  %v669_v44 = vadd.f32 %v2323_v38, %v2212_v14 }
 0x2c4   : > { %v672_v43 = vadd.f32 %v2331_v41, %v2207_v11  ;;  %2084 = vmatprep.subr.msk.bf16.mxu1 %vm259_vm1, %v2264_v48 }
 0x2c5   : > { %v670_v45 = vadd.f32 %v2334_v42, %v2215_v15 }
 0x2c6   : > { %v674_v51 = vpack.c.bf16 %v672_v43, %v671_v46 }
 0x2c7   : > { %1974 = vmatpush3.bf16.msra.mxu1 %v2271_v49  ;;  %v673_v50 = vpack.c.bf16 %v670_v45, %v669_v44  ;;  %v569_v45 = vpop.permute.xlu0 %568 }
 0x2c8   : > { %1989 = vmatprep.subr.bf16.mxu1 %v2234_v28 }
 0x2c9   : > { %1975 = vmatprep.mubr.msk.bf16.mxu1 %vm252_vm0, %v673_v50 }
 0x2ca   : > { %1976 = vmatmul.mubr.msk.bf16.vlgmr.msra.gmra.mrb[8].mxu1 %vm252_vm0, %v674_v51 }
 0x2cb   : > { %1990 = vmatpush3.bf16.msra.mxu1 %v2234_v28  ;;  %v2366_v28 = vpop.permute.xlu1 %901 }
 0x2cc   : > { %1991 = vmatprep.subr.bf16.mxu1 %v2255_v47 }
 0x2cf   : > { %1992 = vmatpush3.bf16.msra.mxu1 %v2255_v47  ;;  %v2370_v47 = vpop.permute.xlu1 %905 }
 0x2d0   : > { %2086 = vmatprep.subr.msk.bf16.mxu1 %vm259_vm1, %v2264_v48 }
 0x2d3   : > { %1994 = vmatpush3.bf16.msra.mxu1 %v2271_v49  ;;  %v2374_v48 = vpop.permute.xlu1 %909  ;;  %v529_v49 = vadd.f32 %v452_v61, %v2238_v30 }
 0x2d4   : > { %2009 = vmatprep.subr.bf16.mxu1 %v2358_v52 }
 0x2d5   : > { %v533_v2 = vmul.f32 3.0, %v529_v49 }
 0x2d7   : > { %v2385_v62 = vpop.permute.xlu1 %913  ;;  %v537_v30 = vadd.f32 %v533_v2, %v2202_v7 }
 0x2db   : > { %v2389_v16 = vpop.permute.xlu1 %1289 }
 0x2df   : > { %v554_v29 = vpop.permute.xlu1 %553 }
 0x391   : > { %v1957_v13 = vpop.f32.mrb[4].mxu1 }
 0x392   : > { %v525_v60 = vmax.f32 %v1957_v13, 0.0  ;;  %v508_v61 = vpop.f32.mrb[5].mxu1 }
 0x393   : > { %v523_v63 = vmax.f32 %v508_v61, 0.0  ;;  %v1958_v34 = vpop.f32.mrb[6].mxu1 }
 0x394   : > { %v541_v0 = vadd.f32 %v537_v30, %v525_v60  ;;  %v526_v4 = vmax.f32 %v1958_v34, 0.0  ;;  %v511_v10 = vpop.f32.mrb[7].mxu1 }
 0x395   : > { %v539_v19 = vadd.f32 %v535_v32, %v523_v63  ;;  %v524_v20 = vmax.f32 %v511_v10, 0.0 }
 0x396   : > { %v545_v22 = vmul.f32 0.125, %v541_v0  ;;  %v542_v23 = vadd.f32 %v538_v37, %v526_v4  ;;  %v2422_v37 = vld [vmem:[%s2178_s18 + $0x10] sm:$0xff]  }
 0x397   : > { %v543_v7 = vmul.f32 0.125, %v539_v19  ;;  %v540_v25 = vadd.f32 %v536_v21, %v524_v20  ;;  %v2428_v21 = vld [vmem:[%s2183_s21 + $0x30] sm:$0xff]  }
 0x398   : > { %v546_v26 = vmul.f32 0.125, %v542_v23  ;;  %v549_v9 = vadd.f32 %v545_v22, %v2221_v18  ;;  %v2441_v22 = vld [vmem:[%s2178_s18 + $0x18] sm:$0xff]  }
 0x399   : > { %v544_v33 = vmul.f32 0.125, %v540_v25  ;;  %v547_v36 = vadd.f32 %v543_v7, %v2212_v14 }
 0x39a   : > { %v550_v44 = vadd.f32 %v546_v26, %v2207_v11  ;;  %v573_v46 = vmul.f32 %v564_v24, %v549_v9 }
 0x39b   : > { %v548_v43 = vadd.f32 %v544_v33, %v2215_v15  ;;  %v571_v12 = vmul.f32 %v554_v29, %v547_v36 }
 0x39c   : > { %v574_v1 = vmul.f32 %v569_v45, %v550_v44  ;;  %v578_v60 = vsel %vm252_vm0, %v573_v46, 0.0 }
 0x39d   : > { %v572_v17 = vmul.f32 %v559_v6, %v548_v43  ;;  %v1977_v50 = vpop.f32.mrb[8].mxu1  ;;  %v575_v58 = vsel %vm252_vm0, %v571_v12, 0.0 }
 0x39e   : > { %v2398_v51 = vmax.f32 %v1977_v50, 0.0  ;;  %v715_v49 = vpop.f32.mrb[9].mxu1  ;;  %v580_v34 = vsel %vm252_vm0, %v574_v1, 0.0 }
 0x39f   : > { %v576_v59 = vsel %vm252_vm0, %v572_v17, 0.0  ;;  %v2402_v2 = vmax.f32 %v715_v49, 0.0  ;;  %v1978_v3 = vpop.f32.mrb[10].mxu1 }
 0x3a0   : > { %v577_v5 = vadd.f32 %v576_v59, %v575_v58  ;;  %v2404_v8 = vmax.f32 %v1978_v3, 0.0  ;;  %v718_v13 = vpop.f32.mrb[11].mxu1  ;;  %v736_v63 = vsub.f32 %v2398_v51, %v2328_v40  ;;  %v805_v25 = vsub.f32 %v2313_v27, %v2398_v51 }
 0x3a1   : > { %v734_v6 = vsub.f32 %v2402_v2, %v2323_v38  ;;  %v2409_v30 = vmax.f32 %v718_v13, 0.0  ;;  %v803_v33 = vsub.f32 %v2316_v31, %v2402_v2 }
 0x3a2   : > { %v579_v61 = vadd.f32 %v578_v60, %v577_v5  ;;  %v737_v32 = vsub.f32 %v2404_v8, %v2331_v41  ;;  %v740_v19 = vadd.f32 %v736_v63, %v2221_v18  ;;  %v806_v12 = vsub.f32 %v2319_v35, %v2404_v8 }
 0x3a3   : > { %v735_v0 = vsub.f32 %v2409_v30, %v2334_v42  ;;  %v738_v10 = vadd.f32 %v734_v6, %v2212_v14  ;;  %v2437_v42 = vld [vmem:[%s2183_s21 + $0x38] ss:$0 sps:$4 sm:$0x33]   ;;  %v804_v17 = vsub.f32 %v2325_v39, %v2409_v30 }
 0x3a4   : > { %v2418_v4 = vadd.f32 %v580_v34, %v579_v61  ;;  %v741_v38 = vadd.f32 %v737_v32, %v2207_v11  ;;  %v2447_v23 = vsel %vm259_vm1, %v2437_v42, 0  ;;  %v2482_v34 = vunpack.c.h.bf16 %v2441_v22 }
 0x3a5   : > { %v739_v40 = vadd.f32 %v735_v0, %v2215_v15 }
 0x3a6   : > { %v743_v20 = vpack.c.bf16 %v741_v38, %v740_v19 }
 0x3a7   : > { %v742_v41 = vpack.c.bf16 %v739_v40, %v738_v10  ;;  %v2488_v10 = vunpack.c.l.bf16 %v2422_v37  ;;  %v2491_v40 = vunpack.c.h.bf16 %v2422_v37 }
 0x3a9   : > { %1985 = vmatprep.mubr.msk.bf16.mxu0 %vm252_vm0, %v742_v41 }
 0x3aa   : > { %1986 = vmatmul.mubr.msk.bf16.vlgmr.msra.gmra.mrb[12].mxu0 %vm252_vm0, %v743_v20  ;;  %v2499_v20 = vunpack.c.l.bf16 %v2441_v22 }
 0x3ab   : > { %2000 = vmatpush3.bf16.msra.mxu0 %v2358_v52  ;;  %2005 = vmatprep.mubr.msk.bf16.mxu0 %vm252_vm0, %v2422_v37 }
 0x3ac   : > { %2001 = vmatprep.subr.bf16.mxu0 %v2428_v21 }
 0x3af   : > { %2002 = vmatpush3.bf16.msra.mxu0 %v2428_v21 }
 0x3b0   : > { %2087 = vmatprep.subr.msk.bf16.mxu0 %vm259_vm1, %v2437_v42 }
 0x3b3   : > { %2004 = vmatpush3.bf16.msra.mxu0 %v2447_v23 }
 0x3b4   : > { %2019 = vmatprep.subr.bf16.mxu0 %v2358_v52 }
 0x3b6   : > { %2006 = vmatmul.mubr.msk.bf16.vlgmr.msra.gmra.mrb[16].mxu0 %vm252_vm0, %v2441_v22 }
 0x3b7   : > { %2020 = vmatpush3.bf16.msra.mxu0 %v2358_v52 }
 0x3b8   : > { %2021 = vmatprep.subr.bf16.mxu0 %v2428_v21 }
 0x3bb   : > { %2022 = vmatpush3.bf16.msra.mxu0 %v2428_v21 }
 0x3bc   : > { %2089 = vmatprep.subr.msk.bf16.mxu0 %vm259_vm1, %v2437_v42 }
 0x3bf   : > { %2024 = vmatpush3.bf16.msra.mxu0 %v2447_v23 }
 0x47d   : > { %v2459_v24 = vpop.f32.mrb[12].mxu0 }
 0x47e   : > { %v801_v7 = vmax.f32 %v2459_v24, 0.0  ;;  %v784_v26 = vpop.f32.mrb[13].mxu0 }
 0x47f   : > { %v799_v29 = vmax.f32 %v784_v26, 0.0  ;;  %v1988_v9 = vpop.f32.mrb[14].mxu0 }
 0x480   : > { %v809_v36 = vadd.f32 %v805_v25, %v801_v7  ;;  %v802_v43 = vmax.f32 %v1988_v9, 0.0  ;;  %v787_v44 = vpop.f32.mrb[15].mxu0 }
 0x481   : > { %v807_v45 = vadd.f32 %v803_v33, %v799_v29  ;;  %v800_v46 = vmax.f32 %v787_v44, 0.0 }
 0x482   : > { %v810_v50 = vadd.f32 %v806_v12, %v802_v43  ;;  %v813_v58 = vadd.f32 %v809_v36, %v2221_v18 }
 0x483   : > { %v808_v49 = vadd.f32 %v804_v17, %v800_v46  ;;  %v811_v1 = vadd.f32 %v807_v45, %v2212_v14  ;;  %v2532_v17 = vld [vmem:[%s2183_s21 + $0x3c] sm:$0xff]  }
 0x484   : > { %v814_v59 = vadd.f32 %v810_v50, %v2207_v11  ;;  %2039 = vmatprep.subr.bf16.mxu0 %v2532_v17  ;;  %v878_v50 = vadd.f32 %v801_v7, %v2398_v51 }
 0x485   : > { %v812_v3 = vadd.f32 %v808_v49, %v2215_v15  ;;  %v876_v49 = vadd.f32 %v799_v29, %v2402_v2 }
 0x486   : > { %v816_v5 = vpack.c.bf16 %v814_v59, %v813_v58  ;;  %v877_v58 = vadd.f32 %v800_v46, %v2409_v30 }
 0x487   : > { %v815_v13 = vpack.c.bf16 %v812_v3, %v811_v1  ;;  %v880_v59 = vmul.f32 3.0, %v876_v49 }
 0x489   : > { %v2007_v60 = vpop.f32.mrb[16].mxu0  ;;  %1995 = vmatprep.mubr.msk.bf16.mxu1 %vm252_vm0, %v815_v13 }
 0x48a   : > { %v2475_v6 = vmax.f32 %v2007_v60, 0.0  ;;  %v1028_v61 = vpop.f32.mrb[17].mxu0  ;;  %1996 = vmatmul.mubr.msk.bf16.vlgmr.msra.gmra.mrb[12].mxu1 %vm252_vm0, %v816_v5 }
 0x48b   : > { %v2478_v63 = vmax.f32 %v1028_v61, 0.0  ;;  %v2008_v32 = vpop.f32.mrb[18].mxu0  ;;  %2010 = vmatpush3.bf16.msra.mxu1 %v2358_v52  ;;  %v884_v61 = vadd.f32 %v880_v59, %v2316_v31 }
 0x48c   : > { %v2484_v0 = vmax.f32 %v2008_v32, 0.0  ;;  %v1031_v38 = vpop.f32.mrb[19].mxu0  ;;  %2011 = vmatprep.subr.bf16.mxu1 %v2428_v21  ;;  %v2502_v24 = vmul.f32 0.33333334, %v2475_v6 }
 0x48d   : > { %v2494_v19 = vmul.f32 0.33333334, %v2478_v63  ;;  %v2496_v41 = vmax.f32 %v1031_v38, 0.0 }
 0x48e   : > { %v2505_v25 = vmul.f32 0.33333334, %v2484_v0  ;;  %v1053_v12 = vadd.f32 %v2502_v24, %v2499_v20 }
 0x48f   : > { %v2508_v26 = vmul.f32 0.33333334, %v2496_v41  ;;  %2012 = vmatpush3.bf16.msra.mxu1 %v2428_v21  ;;  %v1051_v9 = vadd.f32 %v2494_v19, %v2488_v10 }
 0x490   : > { %v1054_v33 = vadd.f32 %v2505_v25, %v2482_v34  ;;  %2088 = vmatprep.subr.msk.bf16.mxu1 %vm259_vm1, %v2437_v42 }
 0x491   : > { %v1052_v36 = vadd.f32 %v2508_v26, %v2491_v40 }
 0x492   : > { %v1056_v45 = vpack.c.bf16 %v1054_v33, %v1053_v12 }
 0x493   : > { %2014 = vmatpush3.bf16.msra.mxu1 %v2447_v23  ;;  %v1055_v44 = vpack.c.bf16 %v1052_v36, %v1051_v9 }
 0x494   : > { %2029 = vmatprep.subr.bf16.mxu1 %v2358_v52 }
 0x495   : > { %2015 = vmatprep.mubr.msk.bf16.mxu1 %vm252_vm0, %v1055_v44 }
 0x496   : > { %2016 = vmatmul.mubr.msk.bf16.vlgmr.msra.gmra.mrb[16].mxu1 %vm252_vm0, %v1056_v45 }
 0x497   : > { %2030 = vmatpush3.bf16.msra.mxu1 %v2358_v52  ;;  %v879_v52 = vadd.f32 %v802_v43, %v2404_v8 }
 0x498   : > { %2031 = vmatprep.subr.bf16.mxu1 %v2428_v21 }
 0x499   : > { %v883_v1 = vmul.f32 3.0, %v879_v52 }
 0x49b   : > { %2032 = vmatpush3.bf16.msra.mxu1 %v2428_v21  ;;  %v882_v21 = vmul.f32 3.0, %v878_v50  ;;  %v887_v2 = vadd.f32 %v883_v1, %v2319_v35 }
 0x49c   : > { %2090 = vmatprep.subr.msk.bf16.mxu1 %vm259_vm1, %v2437_v42  ;;  %v881_v42 = vmul.f32 3.0, %v877_v58 }
 0x49d   : > { %v886_v5 = vadd.f32 %v882_v21, %v2313_v27 }
 0x49e   : > { %v885_v43 = vadd.f32 %v881_v42, %v2325_v39 }
 0x49f   : > { %2034 = vmatpush3.bf16.msra.mxu1 %v2447_v23 }
 0x4a0   : > { %2049 = vmatprep.subr.bf16.mxu1 %v2532_v17 }
 0x55d   : > { %v1997_v3 = vpop.f32.mrb[12].mxu1 }
 0x55e   : > { %v874_v23 = vmax.f32 %v1997_v3, 0.0  ;;  %v857_v13 = vpop.f32.mrb[13].mxu1 }
 0x55f   : > { %v872_v60 = vmax.f32 %v857_v13, 0.0  ;;  %v1998_v32 = vpop.f32.mrb[14].mxu1 }
 0x560   : > { %v890_v51 = vadd.f32 %v886_v5, %v874_v23  ;;  %v875_v7 = vmax.f32 %v1998_v32, 0.0  ;;  %v860_v8 = vpop.f32.mrb[15].mxu1 }
 0x561   : > { %v888_v29 = vadd.f32 %v884_v61, %v872_v60  ;;  %v873_v30 = vmax.f32 %v860_v8, 0.0 }
 0x562   : > { %v894_v46 = vmul.f32 0.125, %v890_v51  ;;  %v891_v38 = vadd.f32 %v887_v2, %v875_v7 }
 0x563   : > { %v892_v33 = vmul.f32 0.125, %v888_v29  ;;  %v889_v9 = vadd.f32 %v885_v43, %v873_v30  ;;  %v2586_v29 = vld [vmem:[%s2183_s21 + $0x4c] ss:$0 sps:$4 sm:$0x33]  }
 0x564   : > { %v895_v36 = vmul.f32 0.125, %v891_v38  ;;  %v898_v27 = vadd.f32 %v894_v46, %v2221_v18  ;;  %v2593_v46 = vsel %vm259_vm1, %v2586_v29, 0 }
 0x565   : > { %v896_v12 = vadd.f32 %v892_v33, %v2212_v14  ;;  %v893_v31 = vmul.f32 0.125, %v889_v9 }
 0x566   : > { %v899_v45 = vadd.f32 %v895_v36, %v2207_v11  ;;  %v918_v50 = vmul.f32 %v2374_v48, %v898_v27 }
 0x567   : > { %v916_v44 = vmul.f32 %v2366_v28, %v896_v12  ;;  %v897_v35 = vadd.f32 %v893_v31, %v2215_v15 }
 0x568   : > { %v919_v18 = vmul.f32 %v2385_v62, %v899_v45  ;;  %v923_v48 = vsel %vm252_vm0, %v918_v50, 0.0 }
 0x569   : > { %v917_v39 = vmul.f32 %v2370_v47, %v897_v35  ;;  %v2017_v49 = vpop.f32.mrb[16].mxu1  ;;  %v920_v21 = vsel %vm252_vm0, %v916_v44, 0.0 }
 0x56a   : > { %v2551_v52 = vmax.f32 %v2017_v49, 0.0  ;;  %v1097_v58 = vpop.f32.mrb[17].mxu1  ;;  %v925_v5 = vsel %vm252_vm0, %v919_v18, 0.0 }
 0x56b   : > { %v921_v14 = vsel %vm252_vm0, %v917_v39, 0.0  ;;  %v2556_v59 = vmax.f32 %v1097_v58, 0.0  ;;  %v2018_v28 = vpop.f32.mrb[18].mxu1 }
 0x56c   : > { %v922_v11 = vadd.f32 %v921_v14, %v920_v21  ;;  %v2558_v1 = vmax.f32 %v2018_v28, 0.0  ;;  %v1100_v15 = vpop.f32.mrb[19].mxu1  ;;  %v1118_v62 = vsub.f32 %v2551_v52, %v2502_v24  ;;  %v1187_v9 = vsub.f32 %v2475_v6, %v2551_v52 }
 0x56d   : > { %v1116_v47 = vsub.f32 %v2556_v59, %v2494_v19  ;;  %v2563_v42 = vmax.f32 %v1100_v15, 0.0 }
 0x56e   : > { %v1119_v3 = vsub.f32 %v2558_v1, %v2505_v25  ;;  %v924_v23 = vadd.f32 %v923_v48, %v922_v11  ;;  %v1122_v51 = vadd.f32 %v1118_v62, %v2499_v20  ;;  %v2577_v25 = vld [vmem:[%s2183_s21 + $0x44] sm:$0xff]   ;;  %v1188_v45 = vsub.f32 %v2484_v0, %v2558_v1 }
 0x56f   : > { %v1117_v13 = vsub.f32 %v2563_v42, %v2508_v26  ;;  %v1120_v19 = vadd.f32 %v1116_v47, %v2488_v10  ;;  %v1186_v49 = vsub.f32 %v2496_v41, %v2563_v42 }
 0x570   : > { %v1123_v60 = vadd.f32 %v1119_v3, %v2482_v34  ;;  %v926_v61 = vadd.f32 %v925_v5, %v924_v23 }
 0x571   : > { %v1121_v32 = vadd.f32 %v1117_v13, %v2491_v40 }
 0x572   : > { %v927_v24 = vrot.slane %v926_v61, 4  ;;  %v1125_v2 = vpack.c.bf16 %v1123_v60, %v1122_v51 }
 0x573   : > { %v1124_v7 = vpack.c.bf16 %v1121_v32, %v1120_v19 }
 0x574   : > { %v928_v8 = vadd.f32 %v927_v24, %v926_v61 }
 0x575   : > { %2025 = vmatprep.mubr.msk.bf16.mxu0 %vm252_vm0, %v1124_v7 }
 0x576   : > { %2026 = vmatmul.mubr.msk.bf16.vlgmr.msra.gmra.mrb[20].mxu0 %vm252_vm0, %v1125_v2  ;;  %v929_v26 = vrot.slane %v928_v8, 2 }
 0x577   : > { %2040 = vmatpush3.bf16.msra.mxu0 %v2532_v17  ;;  %2045 = vmatprep.mubr.msk.bf16.mxu0 %vm252_vm0, %v2422_v37 }
 0x578   : > { %2041 = vmatprep.subr.bf16.mxu0 %v2577_v25  ;;  %v930_v30 = vadd.f32 %v929_v26, %v928_v8 }
 0x57a   : > { %v931_v43 = vrot.slane %v930_v30, 1 }
 0x57b   : > { %2042 = vmatpush3.bf16.msra.mxu0 %v2577_v25 }
 0x57c   : > { %2091 = vmatprep.subr.msk.bf16.mxu0 %vm259_vm1, %v2586_v29  ;;  %v932_v38 = vadd.f32 %v931_v43, %v930_v30 }
 0x57e   : > { %934 = vrot.lane.b32.xlu0 %v932_v38, %s2142_s26 }
 0x57f   : > { %2044 = vmatpush3.bf16.msra.mxu0 %v2593_v46 }
 0x580   : > { %2059 = vmatprep.subr.bf16.mxu0 %v2532_v17 }
 0x582   : > { %2046 = vmatmul.mubr.msk.bf16.vlgmr.msra.gmra.mrb[24].mxu0 %vm252_vm0, %v2441_v22  ;;  %v1185_v22 = vsub.f32 %v2478_v63, %v2556_v59 }
 0x583   : > { %2060 = vmatpush3.bf16.msra.mxu0 %v2532_v17 }
 0x584   : > { %2061 = vmatprep.subr.bf16.mxu0 %v2577_v25 }
 0x587   : > { %2062 = vmatpush3.bf16.msra.mxu0 %v2577_v25 }
 0x588   : > { %2093 = vmatprep.subr.msk.bf16.mxu0 %vm259_vm1, %v2586_v29 }
 0x58b   : > { %2064 = vmatpush3.bf16.msra.mxu0 %v2593_v46 }
 0x649   : > { %v2027_v37 = vpop.f32.mrb[20].mxu0 }
 0x64a   : > { %v1183_v33 = vmax.f32 %v2027_v37, 0.0  ;;  %v1166_v36 = vpop.f32.mrb[21].mxu0 }
 0x64b   : > { %v1181_v27 = vmax.f32 %v1166_v36, 0.0  ;;  %v2028_v12 = vpop.f32.mrb[22].mxu0 }
 0x64c   : > { %v1191_v31 = vadd.f32 %v1187_v9, %v1183_v33  ;;  %v1184_v44 = vmax.f32 %v2028_v12, 0.0  ;;  %v1169_v35 = vpop.f32.mrb[23].mxu0  ;;  %v1260_v38 = vadd.f32 %v1183_v33, %v2551_v52 }
 0x64d   : > { %v1189_v50 = vadd.f32 %v1185_v22, %v1181_v27  ;;  %v1182_v39 = vmax.f32 %v1169_v35, 0.0  ;;  %v1258_v37 = vadd.f32 %v1181_v27, %v2556_v59 }
 0x64e   : > { %v1192_v58 = vadd.f32 %v1188_v45, %v1184_v44  ;;  %v1195_v18 = vadd.f32 %v1191_v31, %v2499_v20  ;;  %v1261_v9 = vadd.f32 %v1184_v44, %v2558_v1  ;;  %v1264_v22 = vmul.f32 3.0, %v1260_v38 }
 0x64f   : > { %v1190_v21 = vadd.f32 %v1186_v49, %v1182_v39  ;;  %v1193_v28 = vadd.f32 %v1189_v50, %v2488_v10  ;;  %v1259_v36 = vadd.f32 %v1182_v39, %v2563_v42  ;;  %v1262_v12 = vmul.f32 3.0, %v1258_v37 }
 0x650   : > { %v1196_v14 = vadd.f32 %v1192_v58, %v2482_v34 }
 0x651   : > { %v1194_v11 = vadd.f32 %v1190_v21, %v2491_v40  ;;  %v1263_v31 = vmul.f32 3.0, %v1259_v36  ;;  %v1295_v21 = vpop.permute.xlu1 %1294 }
 0x652   : > { %v1198_v15 = vpack.c.bf16 %v1196_v14, %v1195_v18 }
 0x653   : > { %v1197_v48 = vpack.c.bf16 %v1194_v11, %v1193_v28  ;;  %v1267_v44 = vadd.f32 %v1263_v31, %v2496_v41 }
 0x655   : > { %v2047_v47 = vpop.f32.mrb[24].mxu0  ;;  %2035 = vmatprep.mubr.msk.bf16.mxu1 %vm252_vm0, %v1197_v48 }
 0x656   : > { %v2619_v62 = vmax.f32 %v2047_v47, 0.0  ;;  %v1377_v3 = vpop.f32.mrb[25].mxu0  ;;  %2036 = vmatmul.mubr.msk.bf16.vlgmr.msra.gmra.mrb[20].mxu1 %vm252_vm0, %v1198_v15  ;;  %v1300_v47 = vpop.permute.xlu1 %1299 }
 0x657   : > { %v2622_v23 = vmax.f32 %v1377_v3, 0.0  ;;  %v2048_v5 = vpop.f32.mrb[26].mxu0  ;;  %2050 = vmatpush3.bf16.msra.mxu1 %v2532_v17 }
 0x658   : > { %v2625_v13 = vmax.f32 %v2048_v5, 0.0  ;;  %v1380_v60 = vpop.f32.mrb[27].mxu0  ;;  %2051 = vmatprep.subr.bf16.mxu1 %v2577_v25  ;;  %v2634_v32 = vmul.f32 0.33333334, %v2619_v62 }
 0x659   : > { %v2629_v61 = vmul.f32 0.33333334, %v2622_v23  ;;  %v2631_v19 = vmax.f32 %v1380_v60, 0.0 }
 0x65a   : > { %v2637_v51 = vmul.f32 0.33333334, %v2625_v13  ;;  %v1402_v26 = vadd.f32 %v2634_v32, %v2499_v20 }
 0x65b   : > { %v2640_v24 = vmul.f32 0.33333334, %v2631_v19  ;;  %2052 = vmatpush3.bf16.msra.mxu1 %v2577_v25  ;;  %v1400_v2 = vadd.f32 %v2629_v61, %v2488_v10 }
 0x65c   : > { %v1403_v7 = vadd.f32 %v2637_v51, %v2482_v34  ;;  %2092 = vmatprep.subr.msk.bf16.mxu1 %vm259_vm1, %v2586_v29 }
 0x65d   : > { %v1401_v8 = vadd.f32 %v2640_v24, %v2491_v40 }
 0x65e   : > { %v1405_v43 = vpack.c.bf16 %v1403_v7, %v1402_v26 }
 0x65f   : > { %2054 = vmatpush3.bf16.msra.mxu1 %v2593_v46  ;;  %v1404_v30 = vpack.c.bf16 %v1401_v8, %v1400_v2 }
 0x660   : > { %2069 = vmatprep.subr.bf16.mxu1 %v2532_v17 }
 0x661   : > { %2055 = vmatprep.mubr.msk.bf16.mxu1 %vm252_vm0, %v1404_v30 }
 0x662   : > { %2056 = vmatmul.mubr.msk.bf16.vlgmr.msra.gmra.mrb[24].mxu1 %vm252_vm0, %v1405_v43 }
 0x663   : > { %2070 = vmatpush3.bf16.msra.mxu1 %v2532_v17  ;;  %v1265_v17 = vmul.f32 3.0, %v1261_v9 }
 0x664   : > { %2071 = vmatprep.subr.bf16.mxu1 %v2577_v25 }
 0x665   : > { %v1269_v59 = vadd.f32 %v1265_v17, %v2484_v0 }
 0x667   : > { %2072 = vmatpush3.bf16.msra.mxu1 %v2577_v25  ;;  %v1268_v25 = vadd.f32 %v1264_v22, %v2475_v6 }
 0x668   : > { %2094 = vmatprep.subr.msk.bf16.mxu1 %vm259_vm1, %v2586_v29 }
 0x66b   : > { %2074 = vmatpush3.bf16.msra.mxu1 %v2593_v46  ;;  %v1266_v46 = vadd.f32 %v1262_v12, %v2478_v63 }
 0x729   : > { %v2037_v45 = vpop.f32.mrb[20].mxu1 }
 0x72a   : > { %v1256_v35 = vmax.f32 %v2037_v45, 0.0  ;;  %v1239_v50 = vpop.f32.mrb[21].mxu1 }
 0x72b   : > { %v1254_v29 = vmax.f32 %v1239_v50, 0.0  ;;  %v2038_v49 = vpop.f32.mrb[22].mxu1 }
 0x72c   : > { %v1272_v52 = vadd.f32 %v1268_v25, %v1256_v35  ;;  %v1257_v33 = vmax.f32 %v2038_v49, 0.0  ;;  %v1242_v1 = vpop.f32.mrb[23].mxu1 }
 0x72d   : > { %v1270_v27 = vadd.f32 %v1266_v46, %v1254_v29  ;;  %v1255_v42 = vmax.f32 %v1242_v1, 0.0 }
 0x72e   : > { %v1276_v39 = vmul.f32 0.125, %v1272_v52  ;;  %v1273_v58 = vadd.f32 %v1269_v59, %v1257_v33 }
 0x72f   : > { %v1274_v18 = vmul.f32 0.125, %v1270_v27  ;;  %v1271_v14 = vadd.f32 %v1267_v44, %v1255_v42 }
 0x730   : > { %v1277_v6 = vmul.f32 0.125, %v1273_v58  ;;  %v1280_v63 = vadd.f32 %v1276_v39, %v2499_v20 }
 0x731   : > { %v1278_v28 = vadd.f32 %v1274_v18, %v2488_v10  ;;  %v1275_v11 = vmul.f32 0.125, %v1271_v14 }
 0x732   : > { %v1281_v48 = vadd.f32 %v1277_v6, %v2482_v34  ;;  %v1304_v3 = vmul.f32 %v1295_v21, %v1280_v63 }
 0x733   : > { %v1302_v15 = vmul.f32 %v2379_v57, %v1278_v28  ;;  %v1279_v0 = vadd.f32 %v1275_v11, %v2491_v40 }
 0x734   : > { %v1305_v26 = vmul.f32 %v1300_v47, %v1281_v48  ;;  %v1309_v9 = vsel %vm252_vm0, %v1304_v3, 0.0 }
 0x735   : > { %v1303_v41 = vmul.f32 %v2389_v16, %v1279_v0  ;;  %v2057_v5 = vpop.f32.mrb[24].mxu1  ;;  %v1306_v2 = vsel %vm252_vm0, %v1302_v15, 0.0 }
 0x736   : > { %v1463_v60 = vmax.f32 %v2057_v5, 0.0  ;;  %v1446_v7 = vpop.f32.mrb[25].mxu1  ;;  %v1311_v31 = vsel %vm252_vm0, %v1305_v26, 0.0 }
 0x737   : > { %v1307_v8 = vsel %vm252_vm0, %v1303_v41, 0.0  ;;  %v1461_v30 = vmax.f32 %v1446_v7, 0.0  ;;  %v2058_v43 = vpop.f32.mrb[26].mxu1 }
 0x738   : > { %v1308_v38 = vadd.f32 %v1307_v8, %v1306_v2  ;;  %v1464_v57 = vmax.f32 %v2058_v43, 0.0  ;;  %v1449_v37 = vpop.f32.mrb[27].mxu1  ;;  %v1467_v12 = vsub.f32 %v1463_v60, %v2634_v32 }
 0x739   : > { %v1465_v36 = vsub.f32 %v1461_v30, %v2629_v61  ;;  %v1462_v22 = vmax.f32 %v1449_v37, 0.0  ;;  %v1534_v59 = vsub.f32 %v2622_v23, %v1461_v30 }
 0x73a   : > { %v1310_v16 = vadd.f32 %v1309_v9, %v1308_v38  ;;  %v1468_v17 = vsub.f32 %v1464_v57, %v2637_v51  ;;  %v1471_v61 = vadd.f32 %v1467_v12, %v2499_v20  ;;  %v1537_v44 = vsub.f32 %v2625_v13, %v1464_v57 }
 0x73b   : > { %v1466_v45 = vsub.f32 %v1462_v22, %v2640_v24  ;;  %v1469_v50 = vadd.f32 %v1465_v36, %v2488_v10  ;;  %v1536_v24 = vsub.f32 %v2619_v62, %v1463_v60  ;;  %v1535_v18 = vsub.f32 %v2631_v19, %v1462_v22 }
 0x73c   : > { %v2685_v35 = vadd.f32 %v1311_v31, %v1310_v16  ;;  %v1472_v25 = vadd.f32 %v1468_v17, %v2482_v34 }
 0x73d   : > { %v1470_v29 = vadd.f32 %v1466_v45, %v2491_v40 }
 0x73e   : > { %v1474_v49 = vpack.c.bf16 %v1472_v25, %v1471_v61 }
 0x73f   : > { %v1473_v46 = vpack.c.bf16 %v1470_v29, %v1469_v50 }
 0x741   : > { %2065 = vmatprep.mubr.msk.bf16.mxu0 %vm252_vm0, %v1473_v46 }
 0x742   : > { %2066 = vmatmul.mubr.msk.bf16.vlgmr.msra.gmra.mrb[28].mxu0 %vm252_vm0, %v1474_v49 }
 0x815   : > { %v2067_v32 = vpop.f32.mrb[28].mxu0 }
 0x816   : > { %v1532_v51 = vmax.f32 %v2067_v32, 0.0  ;;  %v1515_v52 = vpop.f32.mrb[29].mxu0 }
 0x817   : > { %v1530_v33 = vmax.f32 %v1515_v52, 0.0  ;;  %v2068_v1 = vpop.f32.mrb[30].mxu0 }
 0x818   : > { %v1540_v27 = vadd.f32 %v1536_v24, %v1532_v51  ;;  %v1533_v42 = vmax.f32 %v2068_v1, 0.0  ;;  %v1518_v39 = vpop.f32.mrb[31].mxu0  ;;  %v1609_v47 = vadd.f32 %v1532_v51, %v1463_v60 }
 0x819   : > { %v1538_v58 = vadd.f32 %v1534_v59, %v1530_v33  ;;  %v1531_v21 = vmax.f32 %v1518_v39, 0.0  ;;  %v1607_v41 = vadd.f32 %v1530_v33, %v1461_v30  ;;  %v1313_v39 = vrot.slane %v2685_v35, 4 }
 0x81a   : > { %v1541_v14 = vadd.f32 %v1537_v44, %v1533_v42  ;;  %v1544_v28 = vadd.f32 %v1540_v27, %v2499_v20  ;;  %v1610_v3 = vadd.f32 %v1533_v42, %v1464_v57  ;;  %v1613_v7 = vmul.f32 3.0, %v1609_v47 }
 0x81b   : > { %v1539_v6 = vadd.f32 %v1535_v18, %v1531_v21  ;;  %v1542_v63 = vadd.f32 %v1538_v58, %v2488_v10  ;;  %v1608_v5 = vadd.f32 %v1531_v21, %v1462_v22  ;;  %v1611_v2 = vmul.f32 3.0, %v1607_v41 }
 0x81c   : > { %v1545_v11 = vadd.f32 %v1541_v14, %v2482_v34  ;;  %v1614_v8 = vmul.f32 3.0, %v1610_v3  ;;  %v1617_v37 = vadd.f32 %v1613_v7, %v2619_v62  ;;  %v1314_v21 = vadd.f32 %v1313_v39, %v2685_v35 }
 0x81d   : > { %v1543_v15 = vadd.f32 %v1539_v6, %v2491_v40  ;;  %v1612_v26 = vmul.f32 3.0, %v1608_v5  ;;  %v1615_v16 = vadd.f32 %v1611_v2, %v2622_v23 }
 0x81e   : > { %v1547_v0 = vpack.c.bf16 %v1545_v11, %v1544_v28  ;;  %v1618_v60 = vadd.f32 %v1614_v8, %v2625_v13  ;;  %v1315_v14 = vrot.slane %v1314_v21, 2 }
 0x81f   : > { %v1546_v48 = vpack.c.bf16 %v1543_v15, %v1542_v63  ;;  %v1616_v45 = vadd.f32 %v1612_v26, %v2631_v19  ;;  %v935_v15 = vpop.permute.xlu0 %934 }
 0x820   : > { %v1316_v28 = vadd.f32 %v1315_v14, %v1314_v21 }
 0x821   : > { %2075 = vmatprep.mubr.msk.bf16.mxu1 %vm252_vm0, %v1546_v48 }
 0x822   : > { %2076 = vmatmul.mubr.msk.bf16.vlgmr.msra.gmra.mrb[28].mxu1 %vm252_vm0, %v1547_v0  ;;  %v1317_v63 = vrot.slane %v1316_v28, 1 }
 0x824   : > { %v1318_v48 = vadd.f32 %v1317_v63, %v1316_v28 }
 0x8f5   : > { %v2077_v43 = vpop.f32.mrb[28].mxu1 }
 0x8f6   : > { %v1605_v38 = vmax.f32 %v2077_v43, 0.0  ;;  %v1588_v9 = vpop.f32.mrb[29].mxu1 }
 0x8f7   : > { %v1603_v36 = vmax.f32 %v1588_v9, 0.0  ;;  %v2078_v12 = vpop.f32.mrb[30].mxu1 }
 0x8f8   : > { %v1621_v17 = vadd.f32 %v1617_v37, %v1605_v38  ;;  %v1606_v31 = vmax.f32 %v2078_v12, 0.0  ;;  %v1591_v30 = vpop.f32.mrb[31].mxu1 }
 0x8f9   : > { %v1619_v57 = vadd.f32 %v1615_v16, %v1603_v36  ;;  %v1604_v22 = vmax.f32 %v1591_v30, 0.0 }
 0x8fa   : > { %v1625_v25 = vmul.f32 0.125, %v1621_v17  ;;  %v1622_v50 = vadd.f32 %v1618_v60, %v1606_v31 }
 0x8fb   : > { %v1623_v29 = vmul.f32 0.125, %v1619_v57  ;;  %v1620_v61 = vadd.f32 %v1616_v45, %v1604_v22 }
 0x8fc   : > { %v1626_v46 = vmul.f32 0.125, %v1622_v50  ;;  %v1629_v62 = vadd.f32 %v1625_v25, %v2499_v20 }
 0x8fd   : > { %v1627_v49 = vadd.f32 %v1623_v29, %v2488_v10  ;;  %v1624_v23 = vmul.f32 0.125, %v1620_v61 }
 0x8fe   : > { %v1630_v51 = vadd.f32 %v1626_v46, %v2482_v34  ;;  %v1649_v24 = vmul.f32 %v2368_v55, %v1629_v62 }
 0x8ff   : > { %v1647_v32 = vmul.f32 %v2362_v53, %v1627_v49  ;;  %v1628_v13 = vadd.f32 %v1624_v23, %v2491_v40 }
 0x900   : > { %v1650_v33 = vmul.f32 %v2372_v56, %v1630_v51  ;;  %v1654_v10 = vsel %vm252_vm0, %v1649_v24, 0.0  ;;  %v582_v56 = vrot.slane %v2418_v4, 4 }
 0x901   : > { %v1648_v19 = vmul.f32 %v2364_v54, %v1628_v13  ;;  %v1651_v52 = vsel %vm252_vm0, %v1647_v32, 0.0 }
 0x902   : > { %v1656_v53 = vsel %vm252_vm0, %v1650_v33, 0.0  ;;  %v583_v58 = vadd.f32 %v582_v56, %v2418_v4 }
 0x903   : > { %v1652_v59 = vsel %vm252_vm0, %v1648_v19, 0.0 }
 0x904   : > { %v1653_v20 = vadd.f32 %v1652_v59, %v1651_v52  ;;  %v584_v18 = vrot.slane %v583_v58, 2 }
 0x906   : > { %v1655_v1 = vadd.f32 %v1654_v10, %v1653_v20  ;;  %v585_v6 = vadd.f32 %v584_v18, %v583_v58 }
 0x908   : > { %v1657_v27 = vadd.f32 %v1656_v53, %v1655_v1  ;;  %v586_v11 = vrot.slane %v585_v6, 1 }
 0x90a   : > { %v1658_v34 = vrot.slane %v1657_v27, 4  ;;  %v587_v0 = vadd.f32 %v586_v11, %v585_v6 }
 0x90c   : > { %v1659_v42 = vadd.f32 %v1658_v34, %v1657_v27  ;;  %v937_v41 = vsel %vm252_vm0, %v587_v0, %v935_v15 }
 0x90d   : > { %v939_v5 = vsel %vm938_vm2, %v937_v41, 0.0 }
 0x90e   : > { %v1660_v40 = vrot.slane %v1659_v42, 2 }
 0x910   : > { %v1661_v44 = vadd.f32 %v1660_v40, %v1659_v42 }
 0x912   : > { %v1662_v55 = vrot.slane %v1661_v44, 1 }
 0x914   : > { %v1663_v54 = vadd.f32 %v1662_v55, %v1661_v44 }
 0x916   : > { %1665 = vrot.lane.b32.xlu1 %v1663_v54, %s2142_s26 }
 0x988   : > { %v1666_v47 = vpop.permute.xlu1 %1665 }
 0x989   : > { %v1668_v3 = vsel %vm252_vm0, %v1318_v48, %v1666_v47 }
 0x98a   : > { %v1669_v4 = vsel %vm938_vm2, %v1668_v3, 0.0 }
 0x98b   : > { %v1671_v35 = vrot.slane %v1669_v4, 7 }
 0x98d   : > { %v1674_v7 = vsel %vm1673_vm3, %v939_v5, %v1671_v35 }
 0x98e   : > { %1675 = vst [vmem:[%s208_s30] sm:$0x3] %v1674_v7 }
 0x98f PF: > { %s13_s12 = sadd.s32 1, %s2138_s12  }
 0x990   : > { %p10_p4 = scmp.ge.s32.totalorder %s13_s12, 4  }
 0x992   :  { %12 = sbr.rel (!%p10_p4) target bundleno = 1 (0x1), region = 73 }

</bundles_post_ra>
